<compile_context>
chip_gen: v7x
topology: tpu7x:2x2x1
jax: 0.10.0
libtpu: 0.0.40
codegen_flags: <defaults>
</compile_context>

<pallas_src>
import functools
import math

import jax
import jax.numpy as jnp
from jax.experimental import pallas as pl
from jax.experimental.pallas import tpu as pltpu


# ----------------------------- in-kernel helpers -----------------------------

def _layer_norm(x, gamma, beta, eps=1e-6):
    # x: (S, D) f32, gamma/beta: (1, D) f32
    mean = jnp.mean(x, axis=-1, keepdims=True)
    var = jnp.mean((x - mean) ** 2, axis=-1, keepdims=True)
    return (x - mean) * jax.lax.rsqrt(var + eps) * gamma + beta


def _rotate_half(t):
    """rotate_half along the last (per-head) dim: concat([-x2, x1])."""
    dh = t.shape[-1]
    half = dh // 2
    if dh % 128 == 0:
        # lane-aligned fast path: XLU rotate co-issues with VPU/MXU work
        rolled = pltpu.roll(t, half, axis=-1)
        lane = jax.lax.broadcasted_iota(jnp.int32, t.shape, t.ndim - 1)
        return jnp.where(lane < half, -rolled, rolled)
    # narrow per-head dim (demo shapes): lane slice + concat fallback
    # TODO(synk): demo dh=8 does not exercise the pltpu.roll path; validate at
    # dh multiples of 128 before relying on it.
    return jnp.concatenate([-t[..., half:], t[..., :half]], axis=-1)


# ------------------------------- Pallas kernel -------------------------------

def _decoder_stack_kernel(n_heads, causal, exact_softmax, *refs):
    refs = list(refs)
    x_ref = refs.pop(0)
    mask_ref = None if causal else refs.pop(0)
    (cos_ref, sin_ref,
     ln1_g_ref, ln1_b_ref,
     wq_ref, bq_ref, wk_ref, bk_ref, wv_ref, bv_ref, wo_ref, bo_ref,
     ln2_g_ref, ln2_b_ref, w1_ref, b1_ref, w2_ref, b2_ref,
     fin_g_ref, fin_b_ref, o_ref) = refs

    layer = pl.program_id(1)
    last_layer = pl.num_programs(1) - 1

    # Residual stream is resident in the (1,S,D) output block across the whole
    # "arbitrary" layer axis; seed it from the embedded input at layer 0.
    @pl.when(layer == 0)
    def _():
        o_ref[0] = x_ref[0]

    x = o_ref[0].astype(jnp.float32)            # (S, D) residual stream
    S, D = x.shape
    H = n_heads
    dh = D // H

    # ---- additive attention bias, computed once per invocation ----
    if causal:
        row = jax.lax.broadcasted_iota(jnp.int32, (S, S), 0)
        col = jax.lax.broadcasted_iota(jnp.int32, (S, S), 1)
        allowed = row >= col                     # in-kernel causal mask
    else:
        allowed = mask_ref[0] != 0               # int8 user mask
    bias = jnp.where(allowed, 0.0, -1e9).astype(jnp.float32)   # (S, S)

    # ---- sublayer 1: pre-LN multi-head self-attention + residual ----
    xn = _layer_norm(x, ln1_g_ref[0], ln1_b_ref[0]).astype(jnp.bfloat16)
    q = jnp.dot(xn, wq_ref[0], preferred_element_type=jnp.float32) + bq_ref[0]
    k = jnp.dot(xn, wk_ref[0], preferred_element_type=jnp.float32) + bk_ref[0]
    v = jnp.dot(xn, wv_ref[0], preferred_element_type=jnp.float32) + bv_ref[0]

    # Stack heads on a leading (untiled) axis -> (H, S, dh).  Static lane
    # slices + leading-dim concat: no masked partial stores, no VMEM scratch.
    def split_heads(t):
        return jnp.stack([t[:, h * dh:(h + 1) * dh] for h in range(H)], axis=0)

    qh, kh, vh = split_heads(q), split_heads(k), split_heads(v)

    # RoPE: (S, dh) bf16 tables broadcast over heads; 1/sqrt(dh) folded into q.
    cos = cos_ref[...].astype(jnp.float32)
    sin = sin_ref[...].astype(jnp.float32)
    qh = (qh * cos + _rotate_half(qh) * sin) * (1.0 / math.sqrt(dh))
    kh = kh * cos + _rotate_half(kh) * sin

    qh = qh.astype(jnp.bfloat16)
    kh = kh.astype(jnp.bfloat16)
    vh = vh.astype(jnp.bfloat16)

    # TODO(synk): for long sequences replace the full (H,S,S) scores below with
    # flash-style query/KV tiling (extra grid axis + online-softmax scratch).
    s = jnp.einsum('hqd,hkd->hqk', qh, kh,
                   preferred_element_type=jnp.float32) + bias[None]
    s = s - jnp.max(s, axis=-1, keepdims=True)
    p = jnp.exp(s)
    denom = jnp.sum(p, axis=-1, keepdims=True)
    p = p * pl.reciprocal(denom, approx=not exact_softmax)   # EUP when approx

    ctx = jnp.einsum('hqk,hkd->hqd', p.astype(jnp.bfloat16), vh,
                     preferred_element_type=jnp.float32)     # (H, S, dh)

    # Fused output projection: wo pre-reshaped to (H, dh, D) in the wrapper;
    # batched per-head matmul + leading-dim reduction, no ctx materialization.
    attn = jnp.einsum('hqd,hdo->hqo', ctx.astype(jnp.bfloat16), wo_ref[0],
                      preferred_element_type=jnp.float32)
    attn = jnp.sum(attn, axis=0) + bo_ref[0]
    x = x + attn                                  # dropout = identity (eval)

    # ---- sublayer 2: pre-LN ReLU feed-forward + residual ----
    xn2 = _layer_norm(x, ln2_g_ref[0], ln2_b_ref[0]).astype(jnp.bfloat16)
    h1 = jnp.dot(xn2, w1_ref[0], preferred_element_type=jnp.float32) + b1_ref[0]
    h1 = jnp.maximum(h1, 0.0).astype(jnp.bfloat16)
    ff = jnp.dot(h1, w2_ref[0], preferred_element_type=jnp.float32) + b2_ref[0]
    x = x + ff

    o_ref[0] = x.astype(o_ref.dtype)

    # Final LayerNorm folded into the last layer iteration (no extra HBM pass).
    @pl.when(layer == last_layer)
    def _():
        o_ref[0] = _layer_norm(x, fin_g_ref[...], fin_b_ref[...]).astype(o_ref.dtype)


# ------------------------------- Pallas wrapper -------------------------------

_LAYER_PARAM_ORDER = ('ln1_g', 'ln1_b', 'wq', 'bq', 'wk', 'bk', 'wv', 'bv',
                      'wo', 'bo', 'ln2_g', 'ln2_b', 'w1', 'b1', 'w2', 'b2')


def _vmem_limit_bytes():
    """Per-generation scoped-VMEM limit with headroom.

    ~75% of physical, capped at 100 MiB: v5e/v6e (128 MiB physical) -> 96 MiB,
    v7x (64 MiB per TensorCore) -> 48 MiB, leaving room for compiler scratch.
    """
    default = 48 * 1024 * 1024
    try:
        cap = int(pltpu.get_tpu_info().vmem_capacity_bytes)
    except Exception:
        return default
    return max(default, min(cap * 3 // 4, 100 * 1024 * 1024))


def stack_layer_params(layers, n_heads):
    """Stack per-layer params to (L, ...); wo is pre-reshaped to (H, dh, D)."""
    d = layers[0]['wq'].shape[0]
    dh = d // n_heads
    stacked = {}
    for name in _LAYER_PARAM_ORDER:
        arrs = []
        for lp in layers:
            a = lp[name]
            if name == 'wo':
                a = a.reshape(n_heads, dh, a.shape[-1])
            arrs.append(a)
        stacked[name] = jnp.stack(arrs, axis=0)
    return stacked


def decoder_stack(x, x_mask, cos, sin, stacked, norm_g, norm_b, *, n_heads,
                  causal=True, exact_softmax=False):
    """Fused decoder: all layers + final LayerNorm in one pallas_call."""
    B, S, D = x.shape
    L = stacked['wq'].shape[0]

    def batch_block(shape):                       # varies with batch b
        nd = len(shape)
        return pl.BlockSpec((1,) + tuple(shape[1:]),
                            lambda b, l, _nd=nd: (b,) + (0,) * (_nd - 1))

    def layer_block(shape):                       # varies with layer l (prefetched)
        nd = len(shape)
        return pl.BlockSpec((1,) + tuple(shape[1:]),
                            lambda b, l, _nd=nd: (l,) + (0,) * (_nd - 1))

    def resident_block(shape):                    # constant -> stays resident
        nd = len(shape)
        return pl.BlockSpec(tuple(shape), lambda b, l, _nd=nd: (0,) * _nd)

    inputs = [x]
    in_specs = [batch_block(x.shape)]
    if not causal:
        inputs.append(x_mask)
        in_specs.append(batch_block(x_mask.shape))
    inputs += [cos, sin]
    in_specs += [resident_block(cos.shape), resident_block(sin.shape)]
    for name in _LAYER_PARAM_ORDER:
        arr = stacked[name]
        inputs.append(arr)
        in_specs.append(layer_block(arr.shape))
    inputs += [norm_g, norm_b]
    in_specs += [resident_block(norm_g.shape), resident_block(norm_b.shape)]

    kernel = functools.partial(_decoder_stack_kernel, n_heads, causal,
                               exact_softmax)
    return pl.pallas_call(
        kernel,
        out_shape=jax.ShapeDtypeStruct((B, S, D), jnp.float32),
        grid=(B, L),
        in_specs=in_specs,
        out_specs=pl.BlockSpec((1, S, D), lambda b, l: (b, 0, 0)),
        compiler_params=pltpu.CompilerParams(
            dimension_semantics=("parallel", "arbitrary"),
            vmem_limit_bytes=_vmem_limit_bytes()),
    )(*inputs)


# ----------------------------------- glue -----------------------------------

def get_pe_jax(d_model, max_len=5000):
    """JAX port of get_pe() — sinusoidal PE, used only when use_rope=False."""
    position = jnp.arange(max_len, dtype=jnp.float32)[:, None]
    div_term = jnp.exp(jnp.arange(0, d_model, 2, dtype=jnp.float32)
                       * -(math.log(10000.0) / d_model))
    pe = jnp.zeros((max_len, d_model), jnp.float32)
    pe = pe.at[:, 0::2].set(jnp.sin(position * div_term))
    pe = pe.at[:, 1::2].set(jnp.cos(position * div_term))
    return pe


def rope_tables(seq_len, dh):
    inv_freq = 1.0 / (10000.0 ** (jnp.arange(0, dh, 2, dtype=jnp.float32) / dh))
    freqs = jnp.arange(seq_len, dtype=jnp.float32)[:, None] * inv_freq[None, :]
    emb = jnp.concatenate([freqs, freqs], axis=-1)   # (S, dh)
    return jnp.cos(emb), jnp.sin(emb)


def init_params(key, vocab_n, num_layers, d, n_heads, d_ff, use_rope=True):
    del n_heads  # head count only affects the kernel split, not param shapes
    keys = jax.random.split(key, 1 + num_layers)
    params = {'embed': jax.random.normal(keys[0], (vocab_n, d), jnp.float32) * 0.02}
    if not use_rope:
        params['pe'] = get_pe_jax(d)

    def dense(k, fan_in, fan_out):
        # weights stored in bf16: MXU-native operand dtype, half the HBM/VMEM
        w = jax.random.normal(k, (fan_in, fan_out), jnp.float32) / math.sqrt(fan_in)
        return w.astype(jnp.bfloat16)

    layers = []
    for li in range(num_layers):
        lk = jax.random.split(keys[1 + li], 6)
        layers.append({
            'ln1_g': jnp.ones((1, d), jnp.float32), 'ln1_b': jnp.zeros((1, d), jnp.float32),
            'wq': dense(lk[0], d, d), 'bq': jnp.zeros((1, d), jnp.float32),
            'wk': dense(lk[1], d, d), 'bk': jnp.zeros((1, d), jnp.float32),
            'wv': dense(lk[2], d, d), 'bv': jnp.zeros((1, d), jnp.float32),
            'wo': dense(lk[3], d, d), 'bo': jnp.zeros((1, d), jnp.float32),
            'ln2_g': jnp.ones((1, d), jnp.float32), 'ln2_b': jnp.zeros((1, d), jnp.float32),
            'w1': dense(lk[4], d, d_ff), 'b1': jnp.zeros((1, d_ff), jnp.float32),
            'w2': dense(lk[5], d_ff, d), 'b2': jnp.zeros((1, d), jnp.float32),
        })
    params['layers'] = layers
    params['norm_g'] = jnp.ones((1, d), jnp.float32)
    params['norm_b'] = jnp.zeros((1, d), jnp.float32)
    return params


def decoder_for_causal_lm(tokens, x_mask, params, *, n_heads, use_rope=True,
                          causal_mask=True, exact_softmax=False):
    """Forward pass of DecoderForCausalLM.

    tokens: (B, S) int32, x_mask: (B, S, S) (1 = attend, 0 = masked).
    causal_mask=True asserts x_mask is exactly the standard causal mask (no
    padding information) so the kernel regenerates it from iota and never
    streams the (B,S,S) tensor from HBM.  Set causal_mask=False to honor an
    arbitrary x_mask (e.g. one that also masks padded tokens).
    exact_softmax=True uses an exact reciprocal (for tight parity tests).
    Returns (B, S, d) float32 (final LayerNorm output; the module has no LM head).
    """
    d = params['embed'].shape[1]
    assert d % n_heads == 0 and (d // n_heads) % 2 == 0
    # Embed: lookup * sqrt(d)  (gather stays in plain JAX)
    x = jnp.take(params['embed'], tokens, axis=0) * jnp.float32(math.sqrt(d))
    if not use_rope:
        x = x + params['pe'][None, :x.shape[1], :]

    S = x.shape[1]
    dh = d // n_heads
    if use_rope:
        cos, sin = rope_tables(S, dh)
    else:
        cos = jnp.ones((S, dh), jnp.float32)      # identity rotation
        sin = jnp.zeros((S, dh), jnp.float32)
    cos = cos.astype(jnp.bfloat16)                # small (S, dh) bf16 tables
    sin = sin.astype(jnp.bfloat16)

    stacked = stack_layer_params(params['layers'], n_heads)

    if (x_mask is not None) and (not causal_mask):
        x_mask = (x_mask != 0).astype(jnp.int8)   # 4x less mask HBM traffic

    return decoder_stack(x, x_mask, cos, sin, stacked,
                         params['norm_g'], params['norm_b'],
                         n_heads=n_heads, causal=causal_mask,
                         exact_softmax=exact_softmax)


# ----------------------------------- main -----------------------------------

if __name__ == "__main__":
    # small shapes consistent with the module
    vocab_n, num_layers, d, n_heads, max_len, d_ff = 50, 2, 32, 4, 64, 64
    dropout = 0.0  # forward/eval semantics: dropout is identity
    B, S = 2, 8

    key = jax.random.PRNGKey(0)
    params = init_params(key, vocab_n, num_layers, d, n_heads, d_ff, use_rope=True)

    tokens = jax.random.randint(jax.random.fold_in(key, 123), (B, S), 0, vocab_n,
                                dtype=jnp.int32)
    causal = jnp.tril(jnp.ones((S, S), jnp.float32))
    x_mask = jnp.broadcast_to(causal, (B, S, S))

    out = decoder_for_causal_lm(tokens, x_mask, params, n_heads=n_heads,
                                use_rope=True, causal_mask=True)
    out = jax.block_until_ready(out)
    assert out.shape == (B, S, d) and out.dtype == jnp.float32
    assert bool(jnp.all(jnp.isfinite(out)))
    print("KERNEL_OK")
</pallas_src>

<mosaic_0001>
module attributes {stable_mosaic.version = 11 : i64} {
  func.func @_decoder_stack_kernel(%arg0: i32, %arg1: i32, %arg2: memref<1x8x32xf32, #tpu.memory_space<vmem>>, %arg3: memref<8x8xbf16, #tpu.memory_space<vmem>>, %arg4: memref<8x8xbf16, #tpu.memory_space<vmem>>, %arg5: memref<1x1x32xf32, #tpu.memory_space<vmem>>, %arg6: memref<1x1x32xf32, #tpu.memory_space<vmem>>, %arg7: memref<1x32x32xbf16, #tpu.memory_space<vmem>>, %arg8: memref<1x1x32xf32, #tpu.memory_space<vmem>>, %arg9: memref<1x32x32xbf16, #tpu.memory_space<vmem>>, %arg10: memref<1x1x32xf32, #tpu.memory_space<vmem>>, %arg11: memref<1x32x32xbf16, #tpu.memory_space<vmem>>, %arg12: memref<1x1x32xf32, #tpu.memory_space<vmem>>, %arg13: memref<1x4x8x32xbf16, #tpu.memory_space<vmem>>, %arg14: memref<1x1x32xf32, #tpu.memory_space<vmem>>, %arg15: memref<1x1x32xf32, #tpu.memory_space<vmem>>, %arg16: memref<1x1x32xf32, #tpu.memory_space<vmem>>, %arg17: memref<1x32x64xbf16, #tpu.memory_space<vmem>>, %arg18: memref<1x1x64xf32, #tpu.memory_space<vmem>>, %arg19: memref<1x64x32xbf16, #tpu.memory_space<vmem>>, %arg20: memref<1x1x32xf32, #tpu.memory_space<vmem>>, %arg21: memref<1x32xf32, #tpu.memory_space<vmem>>, %arg22: memref<1x32xf32, #tpu.memory_space<vmem>>, %arg23: memref<1x8x32xf32, #tpu.memory_space<vmem>>) attributes {dimension_semantics = [#tpu.dimension_semantics<parallel>, #tpu.dimension_semantics<arbitrary>], iteration_bounds = array<i64: 2, 2>, scalar_prefetch = 0 : i64, scratch_operands = 0 : i64, tpu.core_type = #tpu.core_type<tc>, window_params = [{transform_indices = @transform_0, window_bounds = array<i64: 1, 8, 32>}, {pipeline_mode = #tpu.pipeline_mode<synchronous>, transform_indices = @transform_1, window_bounds = array<i64: 8, 8>}, {pipeline_mode = #tpu.pipeline_mode<synchronous>, transform_indices = @transform_2, window_bounds = array<i64: 8, 8>}, {transform_indices = @transform_3, window_bounds = array<i64: 1, 1, 32>}, {transform_indices = @transform_4, window_bounds = array<i64: 1, 1, 32>}, {transform_indices = @transform_5, window_bounds = array<i64: 1, 32, 32>}, {transform_indices = @transform_6, window_bounds = array<i64: 1, 1, 32>}, {transform_indices = @transform_7, window_bounds = array<i64: 1, 32, 32>}, {transform_indices = @transform_8, window_bounds = array<i64: 1, 1, 32>}, {transform_indices = @transform_9, window_bounds = array<i64: 1, 32, 32>}, {transform_indices = @transform_10, window_bounds = array<i64: 1, 1, 32>}, {transform_indices = @transform_11, window_bounds = array<i64: 1, 4, 8, 32>}, {transform_indices = @transform_12, window_bounds = array<i64: 1, 1, 32>}, {transform_indices = @transform_13, window_bounds = array<i64: 1, 1, 32>}, {transform_indices = @transform_14, window_bounds = array<i64: 1, 1, 32>}, {transform_indices = @transform_15, window_bounds = array<i64: 1, 32, 64>}, {transform_indices = @transform_16, window_bounds = array<i64: 1, 1, 64>}, {transform_indices = @transform_17, window_bounds = array<i64: 1, 64, 32>}, {transform_indices = @transform_18, window_bounds = array<i64: 1, 1, 32>}, {pipeline_mode = #tpu.pipeline_mode<synchronous>, transform_indices = @transform_19, window_bounds = array<i64: 1, 32>}, {pipeline_mode = #tpu.pipeline_mode<synchronous>, transform_indices = @transform_20, window_bounds = array<i64: 1, 32>}, {transform_indices = @transform_21, window_bounds = array<i64: 1, 8, 32>}]} {
    %c0_i32 = arith.constant 0 : i32
    %0 = arith.cmpi eq, %arg1, %c0_i32 : i32
    %1 = arith.extui %0 : i1 to i32
    %c0_i32_0 = arith.constant 0 : i32
    %2 = arith.cmpi ne, %1, %c0_i32_0 : i32
    scf.if %2 {
      %c0_86 = arith.constant 0 : index
      %c0_87 = arith.constant 0 : index
      %c0_88 = arith.constant 0 : index
      %196 = vector.load %arg2[%c0_86, %c0_87, %c0_88] : memref<1x8x32xf32, #tpu.memory_space<vmem>>, vector<1x8x32xf32>
      %197 = vector.shape_cast %196 : vector<1x8x32xf32> to vector<8x32xf32>
      %c0_89 = arith.constant 0 : index
      %c0_90 = arith.constant 0 : index
      %c0_91 = arith.constant 0 : index
      %198 = vector.load %arg23[%c0_89, %c0_90, %c0_91] : memref<1x8x32xf32, #tpu.memory_space<vmem>>, vector<1x8x32xf32>
      %199 = vector.shape_cast %198 : vector<1x8x32xf32> to vector<8x32xf32>
      %200 = vector.shape_cast %197 : vector<8x32xf32> to vector<1x8x32xf32>
      tpu.vector_store %arg23[%c0_89, %c0_90, %c0_91], %200 {strides = array<i32>} : memref<1x8x32xf32, #tpu.memory_space<vmem>>, vector<1x8x32xf32>,
    } else {
    }
    %c0 = arith.constant 0 : index
    %c0_1 = arith.constant 0 : index
    %c0_2 = arith.constant 0 : index
    %3 = vector.load %arg23[%c0, %c0_1, %c0_2] : memref<1x8x32xf32, #tpu.memory_space<vmem>>, vector<1x8x32xf32>
    %4 = vector.shape_cast %3 : vector<1x8x32xf32> to vector<8x32xf32>
    %5 = tpu.iota {dimensions = array<i32: 0>} : vector<8x8xi32>
    %6 = tpu.iota {dimensions = array<i32: 1>} : vector<8x8xi32>
    %7 = arith.cmpi sge, %5, %6 : vector<8x8xi32>
    %cst = arith.constant 0.000000e+00 : f32
    %cst_3 = arith.constant -1.000000e+09 : f32
    %8 = vector.broadcast %cst : f32 to vector<8x8xf32>
    %9 = vector.broadcast %cst_3 : f32 to vector<8x8xf32>
    %10 = arith.select %7, %8, %9 : vector<8x8xi1>, vector<8x8xf32>
    %c0_4 = arith.constant 0 : index
    %c0_5 = arith.constant 0 : index
    %c0_6 = arith.constant 0 : index
    %11 = vector.load %arg5[%c0_4, %c0_5, %c0_6] : memref<1x1x32xf32, #tpu.memory_space<vmem>>, vector<1x1x32xf32>
    %12 = vector.shape_cast %11 : vector<1x1x32xf32> to vector<1x32xf32>
    %c0_7 = arith.constant 0 : index
    %c0_8 = arith.constant 0 : index
    %c0_9 = arith.constant 0 : index
    %13 = vector.load %arg6[%c0_7, %c0_8, %c0_9] : memref<1x1x32xf32, #tpu.memory_space<vmem>>, vector<1x1x32xf32>
    %14 = vector.shape_cast %13 : vector<1x1x32xf32> to vector<1x32xf32>
    %cst_10 = arith.constant dense<0.000000e+00> : vector<8xf32>
    %15 = vector.multi_reduction <add>, %4, %cst_10 [1] : vector<8x32xf32> to vector<8xf32>
    %16 = vector.shape_cast %15 : vector<8xf32> to vector<8x1xf32>
    %cst_11 = arith.constant 3.200000e+01 : f32
    %17 = vector.broadcast %cst_11 : f32 to vector<8x1xf32>
    %18 = arith.divf %16, %17 : vector<8x1xf32>
    %19 = vector.broadcast %18 : vector<8x1xf32> to vector<8x32xf32>
    %20 = arith.subf %4, %19 : vector<8x32xf32>
    %21 = arith.mulf %20, %20 : vector<8x32xf32>
    %cst_12 = arith.constant dense<0.000000e+00> : vector<8xf32>
    %22 = vector.multi_reduction <add>, %21, %cst_12 [1] : vector<8x32xf32> to vector<8xf32>
    %23 = vector.shape_cast %22 : vector<8xf32> to vector<8x1xf32>
    %cst_13 = arith.constant 3.200000e+01 : f32
    %24 = vector.broadcast %cst_13 : f32 to vector<8x1xf32>
    %25 = arith.divf %23, %24 : vector<8x1xf32>
    %26 = vector.broadcast %18 : vector<8x1xf32> to vector<8x32xf32>
    %27 = arith.subf %4, %26 : vector<8x32xf32>
    %cst_14 = arith.constant 9.99999997E-7 : f32
    %28 = vector.broadcast %cst_14 : f32 to vector<8x1xf32>
    %29 = arith.addf %25, %28 : vector<8x1xf32>
    %30 = math.rsqrt %29 : vector<8x1xf32>
    %31 = vector.broadcast %30 : vector<8x1xf32> to vector<8x32xf32>
    %32 = arith.mulf %27, %31 : vector<8x32xf32>
    %33 = vector.broadcast %12 : vector<1x32xf32> to vector<8x32xf32>
    %34 = arith.mulf %32, %33 : vector<8x32xf32>
    %35 = vector.broadcast %14 : vector<1x32xf32> to vector<8x32xf32>
    %36 = arith.addf %34, %35 : vector<8x32xf32>
    %37 = arith.truncf %36 : vector<8x32xf32> to vector<8x32xbf16>
    %c0_15 = arith.constant 0 : index
    %c0_16 = arith.constant 0 : index
    %c0_17 = arith.constant 0 : index
    %38 = vector.load %arg7[%c0_15, %c0_16, %c0_17] : memref<1x32x32xbf16, #tpu.memory_space<vmem>>, vector<1x32x32xbf16>
    %39 = vector.shape_cast %38 : vector<1x32x32xbf16> to vector<32x32xbf16>
    %cst_18 = arith.constant dense<0.000000e+00> : vector<8x32xf32>
    %40 = tpu.matmul %37, %39, %cst_18 {dimension_numbers = #tpu.dot_dimension_numbers<[1], [0], [0], [1], [0, 0, 1, 1], [], []>} : vector<8x32xbf16>, vector<32x32xbf16>, vector<8x32xf32> -> vector<8x32xf32>
    %c0_19 = arith.constant 0 : index
    %c0_20 = arith.constant 0 : index
    %c0_21 = arith.constant 0 : index
    %41 = vector.load %arg8[%c0_19, %c0_20, %c0_21] : memref<1x1x32xf32, #tpu.memory_space<vmem>>, vector<1x1x32xf32>
    %42 = vector.shape_cast %41 : vector<1x1x32xf32> to vector<1x32xf32>
    %43 = vector.broadcast %42 : vector<1x32xf32> to vector<8x32xf32>
    %44 = arith.addf %40, %43 : vector<8x32xf32>
    %c0_22 = arith.constant 0 : index
    %c0_23 = arith.constant 0 : index
    %c0_24 = arith.constant 0 : index
    %45 = vector.load %arg9[%c0_22, %c0_23, %c0_24] : memref<1x32x32xbf16, #tpu.memory_space<vmem>>, vector<1x32x32xbf16>
    %46 = vector.shape_cast %45 : vector<1x32x32xbf16> to vector<32x32xbf16>
    %cst_25 = arith.constant dense<0.000000e+00> : vector<8x32xf32>
    %47 = tpu.matmul %37, %46, %cst_25 {dimension_numbers = #tpu.dot_dimension_numbers<[1], [0], [0], [1], [0, 0, 1, 1], [], []>} : vector<8x32xbf16>, vector<32x32xbf16>, vector<8x32xf32> -> vector<8x32xf32>
    %c0_26 = arith.constant 0 : index
    %c0_27 = arith.constant 0 : index
    %c0_28 = arith.constant 0 : index
    %48 = vector.load %arg10[%c0_26, %c0_27, %c0_28] : memref<1x1x32xf32, #tpu.memory_space<vmem>>, vector<1x1x32xf32>
    %49 = vector.shape_cast %48 : vector<1x1x32xf32> to vector<1x32xf32>
    %50 = vector.broadcast %49 : vector<1x32xf32> to vector<8x32xf32>
    %51 = arith.addf %47, %50 : vector<8x32xf32>
    %c0_29 = arith.constant 0 : index
    %c0_30 = arith.constant 0 : index
    %c0_31 = arith.constant 0 : index
    %52 = vector.load %arg11[%c0_29, %c0_30, %c0_31] : memref<1x32x32xbf16, #tpu.memory_space<vmem>>, vector<1x32x32xbf16>
    %53 = vector.shape_cast %52 : vector<1x32x32xbf16> to vector<32x32xbf16>
    %cst_32 = arith.constant dense<0.000000e+00> : vector<8x32xf32>
    %54 = tpu.matmul %37, %53, %cst_32 {dimension_numbers = #tpu.dot_dimension_numbers<[1], [0], [0], [1], [0, 0, 1, 1], [], []>} : vector<8x32xbf16>, vector<32x32xbf16>, vector<8x32xf32> -> vector<8x32xf32>
    %c0_33 = arith.constant 0 : index
    %c0_34 = arith.constant 0 : index
    %c0_35 = arith.constant 0 : index
    %55 = vector.load %arg12[%c0_33, %c0_34, %c0_35] : memref<1x1x32xf32, #tpu.memory_space<vmem>>, vector<1x1x32xf32>
    %56 = vector.shape_cast %55 : vector<1x1x32xf32> to vector<1x32xf32>
    %57 = vector.broadcast %56 : vector<1x32xf32> to vector<8x32xf32>
    %58 = arith.addf %54, %57 : vector<8x32xf32>
    %59 = vector.extract_strided_slice %44 {offsets = [0, 0], sizes = [8, 8], strides = [1, 1]} : vector<8x32xf32> to vector<8x8xf32>
    %60 = vector.extract_strided_slice %44 {offsets = [0, 8], sizes = [8, 8], strides = [1, 1]} : vector<8x32xf32> to vector<8x8xf32>
    %61 = vector.extract_strided_slice %44 {offsets = [0, 16], sizes = [8, 8], strides = [1, 1]} : vector<8x32xf32> to vector<8x8xf32>
    %62 = vector.extract_strided_slice %44 {offsets = [0, 24], sizes = [8, 8], strides = [1, 1]} : vector<8x32xf32> to vector<8x8xf32>
    %63 = vector.shape_cast %59 : vector<8x8xf32> to vector<1x8x8xf32>
    %64 = vector.shape_cast %60 : vector<8x8xf32> to vector<1x8x8xf32>
    %65 = vector.shape_cast %61 : vector<8x8xf32> to vector<1x8x8xf32>
    %66 = vector.shape_cast %62 : vector<8x8xf32> to vector<1x8x8xf32>
    %67 = tpu.concatenate %63, %64, %65, %66 in 0 : vector<1x8x8xf32>, vector<1x8x8xf32>, vector<1x8x8xf32>, vector<1x8x8xf32> -> vector<4x8x8xf32>
    %68 = vector.extract_strided_slice %51 {offsets = [0, 0], sizes = [8, 8], strides = [1, 1]} : vector<8x32xf32> to vector<8x8xf32>
    %69 = vector.extract_strided_slice %51 {offsets = [0, 8], sizes = [8, 8], strides = [1, 1]} : vector<8x32xf32> to vector<8x8xf32>
    %70 = vector.extract_strided_slice %51 {offsets = [0, 16], sizes = [8, 8], strides = [1, 1]} : vector<8x32xf32> to vector<8x8xf32>
    %71 = vector.extract_strided_slice %51 {offsets = [0, 24], sizes = [8, 8], strides = [1, 1]} : vector<8x32xf32> to vector<8x8xf32>
    %72 = vector.shape_cast %68 : vector<8x8xf32> to vector<1x8x8xf32>
    %73 = vector.shape_cast %69 : vector<8x8xf32> to vector<1x8x8xf32>
    %74 = vector.shape_cast %70 : vector<8x8xf32> to vector<1x8x8xf32>
    %75 = vector.shape_cast %71 : vector<8x8xf32> to vector<1x8x8xf32>
    %76 = tpu.concatenate %72, %73, %74, %75 in 0 : vector<1x8x8xf32>, vector<1x8x8xf32>, vector<1x8x8xf32>, vector<1x8x8xf32> -> vector<4x8x8xf32>
    %77 = vector.extract_strided_slice %58 {offsets = [0, 0], sizes = [8, 8], strides = [1, 1]} : vector<8x32xf32> to vector<8x8xf32>
    %78 = vector.extract_strided_slice %58 {offsets = [0, 8], sizes = [8, 8], strides = [1, 1]} : vector<8x32xf32> to vector<8x8xf32>
    %79 = vector.extract_strided_slice %58 {offsets = [0, 16], sizes = [8, 8], strides = [1, 1]} : vector<8x32xf32> to vector<8x8xf32>
    %80 = vector.extract_strided_slice %58 {offsets = [0, 24], sizes = [8, 8], strides = [1, 1]} : vector<8x32xf32> to vector<8x8xf32>
    %81 = vector.shape_cast %77 : vector<8x8xf32> to vector<1x8x8xf32>
    %82 = vector.shape_cast %78 : vector<8x8xf32> to vector<1x8x8xf32>
    %83 = vector.shape_cast %79 : vector<8x8xf32> to vector<1x8x8xf32>
    %84 = vector.shape_cast %80 : vector<8x8xf32> to vector<1x8x8xf32>
    %85 = tpu.concatenate %81, %82, %83, %84 in 0 : vector<1x8x8xf32>, vector<1x8x8xf32>, vector<1x8x8xf32>, vector<1x8x8xf32> -> vector<4x8x8xf32>
    %c0_36 = arith.constant 0 : index
    %c0_37 = arith.constant 0 : index
    %86 = vector.load %arg3[%c0_36, %c0_37] : memref<8x8xbf16, #tpu.memory_space<vmem>>, vector<8x8xbf16>
    %87 = arith.extf %86 : vector<8x8xbf16> to vector<8x8xf32>
    %c0_38 = arith.constant 0 : index
    %c0_39 = arith.constant 0 : index
    %88 = vector.load %arg4[%c0_38, %c0_39] : memref<8x8xbf16, #tpu.memory_space<vmem>>, vector<8x8xbf16>
    %89 = arith.extf %88 : vector<8x8xbf16> to vector<8x8xf32>
    %90 = vector.shape_cast %87 : vector<8x8xf32> to vector<1x8x8xf32>
    %91 = vector.broadcast %90 : vector<1x8x8xf32> to vector<4x8x8xf32>
    %92 = arith.mulf %67, %91 : vector<4x8x8xf32>
    %93 = vector.extract_strided_slice %67 {offsets = [0, 0, 4], sizes = [4, 8, 4], strides = [1, 1, 1]} : vector<4x8x8xf32> to vector<4x8x4xf32>
    %cst_40 = arith.constant 0.000000e+00 : f32
    %94 = vector.broadcast %cst_40 : f32 to vector<4x8x4xf32>
    %95 = arith.subf %94, %93 : vector<4x8x4xf32>
    %96 = vector.extract_strided_slice %67 {offsets = [0, 0, 0], sizes = [4, 8, 4], strides = [1, 1, 1]} : vector<4x8x8xf32> to vector<4x8x4xf32>
    %97 = tpu.concatenate %95, %96 in 2 : vector<4x8x4xf32>, vector<4x8x4xf32> -> vector<4x8x8xf32>
    %98 = vector.shape_cast %89 : vector<8x8xf32> to vector<1x8x8xf32>
    %99 = vector.broadcast %98 : vector<1x8x8xf32> to vector<4x8x8xf32>
    %100 = arith.mulf %97, %99 : vector<4x8x8xf32>
    %101 = arith.addf %92, %100 : vector<4x8x8xf32>
    %cst_41 = arith.constant 0.353553385 : f32
    %102 = vector.broadcast %cst_41 : f32 to vector<4x8x8xf32>
    %103 = arith.mulf %101, %102 : vector<4x8x8xf32>
    %104 = vector.shape_cast %87 : vector<8x8xf32> to vector<1x8x8xf32>
    %105 = vector.broadcast %104 : vector<1x8x8xf32> to vector<4x8x8xf32>
    %106 = arith.mulf %76, %105 : vector<4x8x8xf32>
    %107 = vector.extract_strided_slice %76 {offsets = [0, 0, 4], sizes = [4, 8, 4], strides = [1, 1, 1]} : vector<4x8x8xf32> to vector<4x8x4xf32>
    %cst_42 = arith.constant 0.000000e+00 : f32
    %108 = vector.broadcast %cst_42 : f32 to vector<4x8x4xf32>
    %109 = arith.subf %108, %107 : vector<4x8x4xf32>
    %110 = vector.extract_strided_slice %76 {offsets = [0, 0, 0], sizes = [4, 8, 4], strides = [1, 1, 1]} : vector<4x8x8xf32> to vector<4x8x4xf32>
    %111 = tpu.concatenate %109, %110 in 2 : vector<4x8x4xf32>, vector<4x8x4xf32> -> vector<4x8x8xf32>
    %112 = vector.shape_cast %89 : vector<8x8xf32> to vector<1x8x8xf32>
    %113 = vector.broadcast %112 : vector<1x8x8xf32> to vector<4x8x8xf32>
    %114 = arith.mulf %111, %113 : vector<4x8x8xf32>
    %115 = arith.addf %106, %114 : vector<4x8x8xf32>
    %116 = arith.truncf %103 : vector<4x8x8xf32> to vector<4x8x8xbf16>
    %117 = arith.truncf %115 : vector<4x8x8xf32> to vector<4x8x8xbf16>
    %118 = arith.truncf %85 : vector<4x8x8xf32> to vector<4x8x8xbf16>
    "tpu.trace_start"() <{level = 10 : i32, message = "hqd,hkd->hqk"}> : () -> ()
    %cst_43 = arith.constant dense<0.000000e+00> : vector<4x8x8xf32>
    %119 = tpu.matmul %116, %117, %cst_43 {dimension_numbers = #tpu.dot_dimension_numbers<[2], [2], [1], [1], [0, 0, 0, 1, 1, 1], [0], [0]>} : vector<4x8x8xbf16>, vector<4x8x8xbf16>, vector<4x8x8xf32> -> vector<4x8x8xf32>
    "tpu.trace_stop"() : () -> ()
    %120 = vector.shape_cast %10 : vector<8x8xf32> to vector<1x8x8xf32>
    %121 = vector.broadcast %120 : vector<1x8x8xf32> to vector<4x8x8xf32>
    %122 = arith.addf %119, %121 : vector<4x8x8xf32>
    %cst_44 = arith.constant dense<0xFF800000> : vector<4x8xf32>
    %123 = vector.multi_reduction <maximumf>, %122, %cst_44 [2] : vector<4x8x8xf32> to vector<4x8xf32>
    %124 = vector.shape_cast %123 : vector<4x8xf32> to vector<4x8x1xf32>
    %125 = vector.broadcast %124 : vector<4x8x1xf32> to vector<4x8x8xf32>
    %126 = arith.subf %122, %125 : vector<4x8x8xf32>
    %127 = math.exp %126 : vector<4x8x8xf32>
    %cst_45 = arith.constant dense<0.000000e+00> : vector<4x8xf32>
    %128 = vector.multi_reduction <add>, %127, %cst_45 [2] : vector<4x8x8xf32> to vector<4x8xf32>
    %129 = vector.shape_cast %128 : vector<4x8xf32> to vector<4x8x1xf32>
    %130 = tpu.reciprocal %129 {approx = true} : vector<4x8x1xf32> -> vector<4x8x1xf32>
    %131 = vector.broadcast %130 : vector<4x8x1xf32> to vector<4x8x8xf32>
    %132 = arith.mulf %127, %131 : vector<4x8x8xf32>
    %133 = arith.truncf %132 : vector<4x8x8xf32> to vector<4x8x8xbf16>
    "tpu.trace_start"() <{level = 10 : i32, message = "hqk,hkd->hqd"}> : () -> ()
    %cst_46 = arith.constant dense<0.000000e+00> : vector<4x8x8xf32>
    %134 = tpu.matmul %133, %118, %cst_46 {dimension_numbers = #tpu.dot_dimension_numbers<[2], [1], [1], [2], [0, 0, 0, 1, 1, 2], [0], [0]>} : vector<4x8x8xbf16>, vector<4x8x8xbf16>, vector<4x8x8xf32> -> vector<4x8x8xf32>
    "tpu.trace_stop"() : () -> ()
    %135 = arith.truncf %134 : vector<4x8x8xf32> to vector<4x8x8xbf16>
    %c0_47 = arith.constant 0 : index
    %c0_48 = arith.constant 0 : index
    %c0_49 = arith.constant 0 : index
    %c0_50 = arith.constant 0 : index
    %136 = vector.load %arg13[%c0_47, %c0_48, %c0_49, %c0_50] : memref<1x4x8x32xbf16, #tpu.memory_space<vmem>>, vector<1x4x8x32xbf16>
    %137 = vector.shape_cast %136 : vector<1x4x8x32xbf16> to vector<4x8x32xbf16>
    "tpu.trace_start"() <{level = 10 : i32, message = "hqd,hdo->hqo"}> : () -> ()
    %cst_51 = arith.constant dense<0.000000e+00> : vector<4x8x32xf32>
    %138 = tpu.matmul %135, %137, %cst_51 {dimension_numbers = #tpu.dot_dimension_numbers<[2], [1], [1], [2], [0, 0, 0, 1, 1, 2], [0], [0]>} : vector<4x8x8xbf16>, vector<4x8x32xbf16>, vector<4x8x32xf32> -> vector<4x8x32xf32>
    "tpu.trace_stop"() : () -> ()
    %cst_52 = arith.constant dense<0.000000e+00> : vector<8x32xf32>
    %139 = vector.multi_reduction <add>, %138, %cst_52 [0] : vector<4x8x32xf32> to vector<8x32xf32>
    %c0_53 = arith.constant 0 : index
    %c0_54 = arith.constant 0 : index
    %c0_55 = arith.constant 0 : index
    %140 = vector.load %arg14[%c0_53, %c0_54, %c0_55] : memref<1x1x32xf32, #tpu.memory_space<vmem>>, vector<1x1x32xf32>
    %141 = vector.shape_cast %140 : vector<1x1x32xf32> to vector<1x32xf32>
    %142 = vector.broadcast %141 : vector<1x32xf32> to vector<8x32xf32>
    %143 = arith.addf %139, %142 : vector<8x32xf32>
    %144 = arith.addf %4, %143 : vector<8x32xf32>
    %c0_56 = arith.constant 0 : index
    %c0_57 = arith.constant 0 : index
    %c0_58 = arith.constant 0 : index
    %145 = vector.load %arg15[%c0_56, %c0_57, %c0_58] : memref<1x1x32xf32, #tpu.memory_space<vmem>>, vector<1x1x32xf32>
    %146 = vector.shape_cast %145 : vector<1x1x32xf32> to vector<1x32xf32>
    %c0_59 = arith.constant 0 : index
    %c0_60 = arith.constant 0 : index
    %c0_61 = arith.constant 0 : index
    %147 = vector.load %arg16[%c0_59, %c0_60, %c0_61] : memref<1x1x32xf32, #tpu.memory_space<vmem>>, vector<1x1x32xf32>
    %148 = vector.shape_cast %147 : vector<1x1x32xf32> to vector<1x32xf32>
    %cst_62 = arith.constant dense<0.000000e+00> : vector<8xf32>
    %149 = vector.multi_reduction <add>, %144, %cst_62 [1] : vector<8x32xf32> to vector<8xf32>
    %150 = vector.shape_cast %149 : vector<8xf32> to vector<8x1xf32>
    %cst_63 = arith.constant 3.200000e+01 : f32
    %151 = vector.broadcast %cst_63 : f32 to vector<8x1xf32>
    %152 = arith.divf %150, %151 : vector<8x1xf32>
    %153 = vector.broadcast %152 : vector<8x1xf32> to vector<8x32xf32>
    %154 = arith.subf %144, %153 : vector<8x32xf32>
    %155 = arith.mulf %154, %154 : vector<8x32xf32>
    %cst_64 = arith.constant dense<0.000000e+00> : vector<8xf32>
    %156 = vector.multi_reduction <add>, %155, %cst_64 [1] : vector<8x32xf32> to vector<8xf32>
    %157 = vector.shape_cast %156 : vector<8xf32> to vector<8x1xf32>
    %cst_65 = arith.constant 3.200000e+01 : f32
    %158 = vector.broadcast %cst_65 : f32 to vector<8x1xf32>
    %159 = arith.divf %157, %158 : vector<8x1xf32>
    %160 = vector.broadcast %152 : vector<8x1xf32> to vector<8x32xf32>
    %161 = arith.subf %144, %160 : vector<8x32xf32>
    %cst_66 = arith.constant 9.99999997E-7 : f32
    %162 = vector.broadcast %cst_66 : f32 to vector<8x1xf32>
    %163 = arith.addf %159, %162 : vector<8x1xf32>
    %164 = math.rsqrt %163 : vector<8x1xf32>
    %165 = vector.broadcast %164 : vector<8x1xf32> to vector<8x32xf32>
    %166 = arith.mulf %161, %165 : vector<8x32xf32>
    %167 = vector.broadcast %146 : vector<1x32xf32> to vector<8x32xf32>
    %168 = arith.mulf %166, %167 : vector<8x32xf32>
    %169 = vector.broadcast %148 : vector<1x32xf32> to vector<8x32xf32>
    %170 = arith.addf %168, %169 : vector<8x32xf32>
    %171 = arith.truncf %170 : vector<8x32xf32> to vector<8x32xbf16>
    %c0_67 = arith.constant 0 : index
    %c0_68 = arith.constant 0 : index
    %c0_69 = arith.constant 0 : index
    %172 = vector.load %arg17[%c0_67, %c0_68, %c0_69] : memref<1x32x64xbf16, #tpu.memory_space<vmem>>, vector<1x32x64xbf16>
    %173 = vector.shape_cast %172 : vector<1x32x64xbf16> to vector<32x64xbf16>
    %cst_70 = arith.constant dense<0.000000e+00> : vector<8x64xf32>
    %174 = tpu.matmul %171, %173, %cst_70 {dimension_numbers = #tpu.dot_dimension_numbers<[1], [0], [0], [1], [0, 0, 1, 1], [], []>} : vector<8x32xbf16>, vector<32x64xbf16>, vector<8x64xf32> -> vector<8x64xf32>
    %c0_71 = arith.constant 0 : index
    %c0_72 = arith.constant 0 : index
    %c0_73 = arith.constant 0 : index
    %175 = vector.load %arg18[%c0_71, %c0_72, %c0_73] : memref<1x1x64xf32, #tpu.memory_space<vmem>>, vector<1x1x64xf32>
    %176 = vector.shape_cast %175 : vector<1x1x64xf32> to vector<1x64xf32>
    %177 = vector.broadcast %176 : vector<1x64xf32> to vector<8x64xf32>
    %178 = arith.addf %174, %177 : vector<8x64xf32>
    %cst_74 = arith.constant 0.000000e+00 : f32
    %179 = vector.broadcast %cst_74 : f32 to vector<8x64xf32>
    %180 = arith.maximumf %178, %179 : vector<8x64xf32>
    %181 = arith.truncf %180 : vector<8x64xf32> to vector<8x64xbf16>
    %c0_75 = arith.constant 0 : index
    %c0_76 = arith.constant 0 : index
    %c0_77 = arith.constant 0 : index
    %182 = vector.load %arg19[%c0_75, %c0_76, %c0_77] : memref<1x64x32xbf16, #tpu.memory_space<vmem>>, vector<1x64x32xbf16>
    %183 = vector.shape_cast %182 : vector<1x64x32xbf16> to vector<64x32xbf16>
    %cst_78 = arith.constant dense<0.000000e+00> : vector<8x32xf32>
    %184 = tpu.matmul %181, %183, %cst_78 {dimension_numbers = #tpu.dot_dimension_numbers<[1], [0], [0], [1], [0, 0, 1, 1], [], []>} : vector<8x64xbf16>, vector<64x32xbf16>, vector<8x32xf32> -> vector<8x32xf32>
    %c0_79 = arith.constant 0 : index
    %c0_80 = arith.constant 0 : index
    %c0_81 = arith.constant 0 : index
    %185 = vector.load %arg20[%c0_79, %c0_80, %c0_81] : memref<1x1x32xf32, #tpu.memory_space<vmem>>, vector<1x1x32xf32>
    %186 = vector.shape_cast %185 : vector<1x1x32xf32> to vector<1x32xf32>
    %187 = vector.broadcast %186 : vector<1x32xf32> to vector<8x32xf32>
    %188 = arith.addf %184, %187 : vector<8x32xf32>
    %189 = arith.addf %144, %188 : vector<8x32xf32>
    %c0_82 = arith.constant 0 : index
    %c0_83 = arith.constant 0 : index
    %c0_84 = arith.constant 0 : index
    %190 = vector.load %arg23[%c0_82, %c0_83, %c0_84] : memref<1x8x32xf32, #tpu.memory_space<vmem>>, vector<1x8x32xf32>
    %191 = vector.shape_cast %190 : vector<1x8x32xf32> to vector<8x32xf32>
    %192 = vector.shape_cast %189 : vector<8x32xf32> to vector<1x8x32xf32>
    tpu.vector_store %arg23[%c0_82, %c0_83, %c0_84], %192 {strides = array<i32>} : memref<1x8x32xf32, #tpu.memory_space<vmem>>, vector<1x8x32xf32>,
    %c1_i32 = arith.constant 1 : i32
    %193 = arith.cmpi eq, %arg1, %c1_i32 : i32
    %194 = arith.extui %193 : i1 to i32
    %c0_i32_85 = arith.constant 0 : i32
    %195 = arith.cmpi ne, %194, %c0_i32_85 : i32
    scf.if %195 {
      %c0_86 = arith.constant 0 : index
      %c0_87 = arith.constant 0 : index
      %196 = vector.load %arg21[%c0_86, %c0_87] : memref<1x32xf32, #tpu.memory_space<vmem>>, vector<1x32xf32>
      %c0_88 = arith.constant 0 : index
      %c0_89 = arith.constant 0 : index
      %197 = vector.load %arg22[%c0_88, %c0_89] : memref<1x32xf32, #tpu.memory_space<vmem>>, vector<1x32xf32>
      %cst_90 = arith.constant dense<0.000000e+00> : vector<8xf32>
      %198 = vector.multi_reduction <add>, %189, %cst_90 [1] : vector<8x32xf32> to vector<8xf32>
      %199 = vector.shape_cast %198 : vector<8xf32> to vector<8x1xf32>
      %cst_91 = arith.constant 3.200000e+01 : f32
      %200 = vector.broadcast %cst_91 : f32 to vector<8x1xf32>
      %201 = arith.divf %199, %200 : vector<8x1xf32>
      %202 = vector.broadcast %201 : vector<8x1xf32> to vector<8x32xf32>
      %203 = arith.subf %189, %202 : vector<8x32xf32>
      %204 = arith.mulf %203, %203 : vector<8x32xf32>
      %cst_92 = arith.constant dense<0.000000e+00> : vector<8xf32>
      %205 = vector.multi_reduction <add>, %204, %cst_92 [1] : vector<8x32xf32> to vector<8xf32>
      %206 = vector.shape_cast %205 : vector<8xf32> to vector<8x1xf32>
      %cst_93 = arith.constant 3.200000e+01 : f32
      %207 = vector.broadcast %cst_93 : f32 to vector<8x1xf32>
      %208 = arith.divf %206, %207 : vector<8x1xf32>
      %209 = vector.broadcast %201 : vector<8x1xf32> to vector<8x32xf32>
      %210 = arith.subf %189, %209 : vector<8x32xf32>
      %cst_94 = arith.constant 9.99999997E-7 : f32
      %211 = vector.broadcast %cst_94 : f32 to vector<8x1xf32>
      %212 = arith.addf %208, %211 : vector<8x1xf32>
      %213 = math.rsqrt %212 : vector<8x1xf32>
      %214 = vector.broadcast %213 : vector<8x1xf32> to vector<8x32xf32>
      %215 = arith.mulf %210, %214 : vector<8x32xf32>
      %216 = vector.broadcast %196 : vector<1x32xf32> to vector<8x32xf32>
      %217 = arith.mulf %215, %216 : vector<8x32xf32>
      %218 = vector.broadcast %197 : vector<1x32xf32> to vector<8x32xf32>
      %219 = arith.addf %217, %218 : vector<8x32xf32>
      %c0_95 = arith.constant 0 : index
      %c0_96 = arith.constant 0 : index
      %c0_97 = arith.constant 0 : index
      %220 = vector.load %arg23[%c0_95, %c0_96, %c0_97] : memref<1x8x32xf32, #tpu.memory_space<vmem>>, vector<1x8x32xf32>
      %221 = vector.shape_cast %220 : vector<1x8x32xf32> to vector<8x32xf32>
      %222 = vector.shape_cast %219 : vector<8x32xf32> to vector<1x8x32xf32>
      tpu.vector_store %arg23[%c0_95, %c0_96, %c0_97], %222 {strides = array<i32>} : memref<1x8x32xf32, #tpu.memory_space<vmem>>, vector<1x8x32xf32>,
    } else {
    }
    return
  }
  func.func @transform_0(%arg0: i32, %arg1: i32) -> (i32, i32, i32) {
    %c0_i32 = arith.constant 0 : i32
    %c0_i32_0 = arith.constant 0 : i32
    %c0_i32_1 = arith.constant 0 : i32
    return %arg0, %c0_i32, %c0_i32_0 : i32, i32, i32
  }
  func.func @transform_1(%arg0: i32, %arg1: i32) -> (i32, i32) {
    %c0_i32 = arith.constant 0 : i32
    %c0_i32_0 = arith.constant 0 : i32
    %c0_i32_1 = arith.constant 0 : i32
    return %c0_i32, %c0_i32_0 : i32, i32
  }
  func.func @transform_2(%arg0: i32, %arg1: i32) -> (i32, i32) {
    %c0_i32 = arith.constant 0 : i32
    %c0_i32_0 = arith.constant 0 : i32
    %c0_i32_1 = arith.constant 0 : i32
    return %c0_i32, %c0_i32_0 : i32, i32
  }
  func.func @transform_3(%arg0: i32, %arg1: i32) -> (i32, i32, i32) {
    %c0_i32 = arith.constant 0 : i32
    %c0_i32_0 = arith.constant 0 : i32
    %c0_i32_1 = arith.constant 0 : i32
    return %arg1, %c0_i32, %c0_i32_0 : i32, i32, i32
  }
  func.func @transform_4(%arg0: i32, %arg1: i32) -> (i32, i32, i32) {
    %c0_i32 = arith.constant 0 : i32
    %c0_i32_0 = arith.constant 0 : i32
    %c0_i32_1 = arith.constant 0 : i32
    return %arg1, %c0_i32, %c0_i32_0 : i32, i32, i32
  }
  func.func @transform_5(%arg0: i32, %arg1: i32) -> (i32, i32, i32) {
    %c0_i32 = arith.constant 0 : i32
    %c0_i32_0 = arith.constant 0 : i32
    %c0_i32_1 = arith.constant 0 : i32
    return %arg1, %c0_i32, %c0_i32_0 : i32, i32, i32
  }
  func.func @transform_6(%arg0: i32, %arg1: i32) -> (i32, i32, i32) {
    %c0_i32 = arith.constant 0 : i32
    %c0_i32_0 = arith.constant 0 : i32
    %c0_i32_1 = arith.constant 0 : i32
    return %arg1, %c0_i32, %c0_i32_0 : i32, i32, i32
  }
  func.func @transform_7(%arg0: i32, %arg1: i32) -> (i32, i32, i32) {
    %c0_i32 = arith.constant 0 : i32
    %c0_i32_0 = arith.constant 0 : i32
    %c0_i32_1 = arith.constant 0 : i32
    return %arg1, %c0_i32, %c0_i32_0 : i32, i32, i32
  }
  func.func @transform_8(%arg0: i32, %arg1: i32) -> (i32, i32, i32) {
    %c0_i32 = arith.constant 0 : i32
    %c0_i32_0 = arith.constant 0 : i32
    %c0_i32_1 = arith.constant 0 : i32
    return %arg1, %c0_i32, %c0_i32_0 : i32, i32, i32
  }
  func.func @transform_9(%arg0: i32, %arg1: i32) -> (i32, i32, i32) {
    %c0_i32 = arith.constant 0 : i32
    %c0_i32_0 = arith.constant 0 : i32
    %c0_i32_1 = arith.constant 0 : i32
    return %arg1, %c0_i32, %c0_i32_0 : i32, i32, i32
  }
  func.func @transform_10(%arg0: i32, %arg1: i32) -> (i32, i32, i32) {
    %c0_i32 = arith.constant 0 : i32
    %c0_i32_0 = arith.constant 0 : i32
    %c0_i32_1 = arith.constant 0 : i32
    return %arg1, %c0_i32, %c0_i32_0 : i32, i32, i32
  }
  func.func @transform_11(%arg0: i32, %arg1: i32) -> (i32, i32, i32, i32) {
    %c0_i32 = arith.constant 0 : i32
    %c0_i32_0 = arith.constant 0 : i32
    %c0_i32_1 = arith.constant 0 : i32
    %c0_i32_2 = arith.constant 0 : i32
    return %arg1, %c0_i32, %c0_i32_0, %c0_i32_1 : i32, i32, i32, i32
  }
  func.func @transform_12(%arg0: i32, %arg1: i32) -> (i32, i32, i32) {
    %c0_i32 = arith.constant 0 : i32
    %c0_i32_0 = arith.constant 0 : i32
    %c0_i32_1 = arith.constant 0 : i32
    return %arg1, %c0_i32, %c0_i32_0 : i32, i32, i32
  }
  func.func @transform_13(%arg0: i32, %arg1: i32) -> (i32, i32, i32) {
    %c0_i32 = arith.constant 0 : i32
    %c0_i32_0 = arith.constant 0 : i32
    %c0_i32_1 = arith.constant 0 : i32
    return %arg1, %c0_i32, %c0_i32_0 : i32, i32, i32
  }
  func.func @transform_14(%arg0: i32, %arg1: i32) -> (i32, i32, i32) {
    %c0_i32 = arith.constant 0 : i32
    %c0_i32_0 = arith.constant 0 : i32
    %c0_i32_1 = arith.constant 0 : i32
    return %arg1, %c0_i32, %c0_i32_0 : i32, i32, i32
  }
  func.func @transform_15(%arg0: i32, %arg1: i32) -> (i32, i32, i32) {
    %c0_i32 = arith.constant 0 : i32
    %c0_i32_0 = arith.constant 0 : i32
    %c0_i32_1 = arith.constant 0 : i32
    return %arg1, %c0_i32, %c0_i32_0 : i32, i32, i32
  }
  func.func @transform_16(%arg0: i32, %arg1: i32) -> (i32, i32, i32) {
    %c0_i32 = arith.constant 0 : i32
    %c0_i32_0 = arith.constant 0 : i32
    %c0_i32_1 = arith.constant 0 : i32
    return %arg1, %c0_i32, %c0_i32_0 : i32, i32, i32
  }
  func.func @transform_17(%arg0: i32, %arg1: i32) -> (i32, i32, i32) {
    %c0_i32 = arith.constant 0 : i32
    %c0_i32_0 = arith.constant 0 : i32
    %c0_i32_1 = arith.constant 0 : i32
    return %arg1, %c0_i32, %c0_i32_0 : i32, i32, i32
  }
  func.func @transform_18(%arg0: i32, %arg1: i32) -> (i32, i32, i32) {
    %c0_i32 = arith.constant 0 : i32
    %c0_i32_0 = arith.constant 0 : i32
    %c0_i32_1 = arith.constant 0 : i32
    return %arg1, %c0_i32, %c0_i32_0 : i32, i32, i32
  }
  func.func @transform_19(%arg0: i32, %arg1: i32) -> (i32, i32) {
    %c0_i32 = arith.constant 0 : i32
    %c0_i32_0 = arith.constant 0 : i32
    %c0_i32_1 = arith.constant 0 : i32
    return %c0_i32, %c0_i32_0 : i32, i32
  }
  func.func @transform_20(%arg0: i32, %arg1: i32) -> (i32, i32) {
    %c0_i32 = arith.constant 0 : i32
    %c0_i32_0 = arith.constant 0 : i32
    %c0_i32_1 = arith.constant 0 : i32
    return %c0_i32, %c0_i32_0 : i32, i32
  }
  func.func @transform_21(%arg0: i32, %arg1: i32) -> (i32, i32, i32) {
    %c0_i32 = arith.constant 0 : i32
    %c0_i32_0 = arith.constant 0 : i32
    %c0_i32_1 = arith.constant 0 : i32
    return %arg0, %c0_i32, %c0_i32_0 : i32, i32, i32
  }
}

</mosaic_0001>

<bundles_post_ra>
// kernel: tpu_custom_call.1
= control target key start
LH: loop header
LB: loop body
LE: loop exit
PB: predicated region body
PF: predicated region fallthrough
CT: control target
= control target key end

     0   :  { %s4811_s0 = inlined_call_operand.hbm [shape: f32[2,8,32], index: 0, kind: input, shape index: {}]   ;;  %s4812_s1 = inlined_call_operand.hbm [shape: bf16[8,8], index: 1, kind: input, shape index: {}]   ;;  %s4813_s2 = inlined_call_operand.hbm [shape: bf16[8,8], index: 2, kind: input, shape index: {}]   ;;  %s4814_s3 = inlined_call_operand.hbm [shape: f32[2,1,32], index: 3, kind: input, shape index: {}]   ;;  %s4815_s4 = inlined_call_operand.hbm [shape: f32[2,1,32], index: 4, kind: input, shape index: {}]   ;;  %s4816_s5 = inlined_call_operand.vmem [shape: bf16[2,32,32], index: 5, kind: input, shape index: {}]   ;;  %s4817_s6 = inlined_call_operand.hbm [shape: f32[2,1,32], index: 6, kind: input, shape index: {}]   ;;  %s4818_s7 = inlined_call_operand.vmem [shape: bf16[2,32,32], index: 7, kind: input, shape index: {}]   ;;  %s4819_s8 = inlined_call_operand.hbm [shape: f32[2,1,32], index: 8, kind: input, shape index: {}]   ;;  %s4820_s9 = inlined_call_operand.vmem [shape: bf16[2,32,32], index: 9, kind: input, shape index: {}]   ;;  %s4821_s10 = inlined_call_operand.hbm [shape: f32[2,1,32], index: 10, kind: input, shape index: {}]   ;;  %s4822_s11 = inlined_call_operand.vmem [shape: bf16[2,4,8,32], index: 11, kind: input, shape index: {}]   ;;  %s4823_s12 = inlined_call_operand.hbm [shape: f32[2,1,32], index: 12, kind: input, shape index: {}]   ;;  %s4824_s13 = inlined_call_operand.hbm [shape: f32[2,1,32], index: 13, kind: input, shape index: {}]   ;;  %s4825_s14 = inlined_call_operand.hbm [shape: f32[2,1,32], index: 14, kind: input, shape index: {}]   ;;  %s4826_s15 = inlined_call_operand.hbm [shape: bf16[2,32,64], index: 15, kind: input, shape index: {}]   ;;  %s4827_s16 = inlined_call_operand.hbm [shape: f32[2,1,64], index: 16, kind: input, shape index: {}]   ;;  %s4828_s17 = inlined_call_operand.vmem [shape: bf16[2,64,32], index: 17, kind: input, shape index: {}]   ;;  %s4829_s18 = inlined_call_operand.vmem [shape: f32[2,1,32], index: 18, kind: input, shape index: {}]   ;;  %s4830_s19 = inlined_call_operand.vmem [shape: f32[1,32], index: 19, kind: input, shape index: {}]   ;;  %s4831_s20 = inlined_call_operand.vmem [shape: f32[1,32], index: 20, kind: input, shape index: {}]   ;;  %s4832_s21 = inlined_call_operand.hbm [shape: f32[2,8,32], index: 21, kind: output, shape index: {}]  }
   0x1   :  { %4880 = sst [smem:[#allocation48_spill]] %s4811_s0 }
   0x2   :  { %4881 = sst [smem:[#allocation49_spill]] %s4812_s1 }
   0x3   :  { %4882 = sst [smem:[#allocation50_spill]] %s4813_s2 }
   0x4   :  { %4883 = sst [smem:[#allocation51_spill]] %s4814_s3 }
   0x5   :  { %4884 = sst [smem:[#allocation52_spill]] %s4815_s4 }
   0x6   :  { %4885 = sst [smem:[#allocation53_spill]] %s4816_s5 }
   0x7   :  { %4886 = sst [smem:[#allocation54_spill]] %s4817_s6 }
   0x8   :  { %4887 = sst [smem:[#allocation55_spill]] %s4818_s7 }
   0x9   :  { %4888 = sst [smem:[#allocation56_spill]] %s4819_s8 }
   0xa   :  { %4889 = sst [smem:[#allocation57_spill]] %s4820_s9 }
   0xb   :  { %4890 = sst [smem:[#allocation58_spill]] %s4821_s10 }
   0xc   :  { %4891 = sst [smem:[#allocation59_spill]] %s4822_s11 }
   0xd   :  { %4892 = sst [smem:[#allocation60_spill]] %s4823_s12 }
   0xe   :  { %4893 = sst [smem:[#allocation61_spill]] %s4824_s13 }
   0xf   :  { %4894 = sst [smem:[#allocation62_spill]] %s4825_s14 }
  0x10   :  { %4895 = sst [smem:[#allocation63_spill]] %s4826_s15 }
  0x11   :  { %4896 = sst [smem:[#allocation64_spill]] %s4827_s16 }
  0x12   :  { %4897 = sst [smem:[#allocation65_spill]] %s4828_s17 }
  0x13   :  { %4898 = sst [smem:[#allocation66_spill]] %s4829_s18 }
  0x14   :  { %4899 = sst [smem:[#allocation67_spill]] %s4830_s19 }
  0x15   :  { %4900 = sst [smem:[#allocation68_spill]] %s4831_s20 }
  0x16   :  { %4901 = sst [smem:[#allocation69_spill]] %s4832_s21 }
  0x17   :  { %26 = vsyncpa [#allocation3], 0 }
  0x18   :  { %28 = vsyncpa [#allocation3 + $0x1], 0 }
  0x19   :  { %29 = vsyncpa [#allocation6], 0 }
  0x1a   :  { %30 = vsyncpa [#allocation9], 0 }
  0x1b   :  { %32 = vsyncpa [#allocation9 + $0x1], 0 }
  0x1c   :  { %33 = vsyncpa [#allocation12], 0 }
  0x1d   :  { %35 = vsyncpa [#allocation12 + $0x1], 0 }
  0x1e   :  { %36 = vsyncpa [#allocation15], 0 }
  0x1f   :  { %38 = vsyncpa [#allocation15 + $0x1], 0 }
  0x20   :  { %39 = vsyncpa [#allocation18], 0 }
  0x21   :  { %41 = vsyncpa [#allocation18 + $0x1], 0 }
  0x22   :  { %42 = vsyncpa [#allocation21], 0 }
  0x23   :  { %44 = vsyncpa [#allocation21 + $0x1], 0 }
  0x24   :  { %45 = vsyncpa [#allocation4], 0 }
  0x25   :  { %47 = vsyncpa [#allocation4 + $0x1], 0  ;;  %s3885_s2 = smov 0   ;;  %s3887_s25 = smov 0  }
  0x26   :  { %s3889_s26 = smov 0   ;;  %s3891_s27 = smov 0  }
  0x27   :  { %s3893_s3 = smov 0   ;;  %s3895_s28 = smov 0  }
  0x28   :  { %s3897_s29 = smov 0   ;;  %s3899_s0 = smov 0  }
  0x29   :  { %s3901_s4 = smov 0   ;;  %s3903_s30 = smov 0  }
  0x2a   :  { %s3905_s5 = smov 0  }
  0x2b LB: > { %4902 = sst [smem:[#allocation32_spill]] %s3713_s25  ;;  %s3939_s22 = sadd.s32 4294967295, %s3749_s5   ;;  %s3749_s5 = sphi %s3905_s5, %s53_s5   ;;  %s3745_s30 = sphi %s3903_s30, %s5010_s30   ;;  %s3741_s4 = sphi %s3901_s4, %s5009_s4   ;;  %s3737_s0 = sphi %s3899_s0, %s5008_s0   ;;  %s3733_s29 = sphi %s3897_s29, %s5007_s29   ;;  %s3729_s28 = sphi %s3895_s28, %s5006_s28   ;;  %s3725_s3 = sphi %s3893_s3, %s5005_s3   ;;  %s3721_s27 = sphi %s3891_s27, %s5004_s27   ;;  %s3717_s26 = sphi %s3889_s26, %s5003_s26   ;;  %s3713_s25 = sphi %s3887_s25, %s5002_s25   ;;  %s3709_s2 = sphi %s3885_s2, %s5001_s2  }
  0x2c   : > { %4903 = sst [smem:[#allocation33_spill]] %s3717_s26  ;;  %p4845_p0 = scmp.eq.s32.totalorder %s3749_s5, 0 }
  0x2d   : > { %4904 = sst [smem:[#allocation34_spill]] %s3721_s27  ;;  %p4844_p1 = scmp.eq.s32.totalorder %s3939_s22, 0 }
  0x2e   : > { %4905 = sst [smem:[#allocation35_spill]] %s3725_s3  ;;  %p147_p2 = scmp.ne.s32.totalorder %s3717_s26, %s3713_s25 }
  0x2f   : > { %4906 = sst [smem:[#allocation36_spill]] %s3729_s28  ;;  %p153_p3 = scmp.ne.s32.totalorder %s3713_s25, %s3709_s2 }
  0x30   : > { %4907 = sst [smem:[#allocation37_spill]] %s3733_s29  ;;  %p2756_p5 = scmp.ge.s32.totalorder %s3749_s5, 1 }
  0x31   : > { %4908 = sst [smem:[#allocation38_spill]] %s3737_s0  ;;  %p149_p6 = por %p147_p2, %p4845_p0 }
  0x32   : > { %4909 = sst [smem:[#allocation39_spill]] %s3741_s4  ;;  %p3953_p7 = por %p153_p3, %p4844_p1 }
  0x33   : > { %4910 = sst [smem:[#allocation40_spill]] %s3745_s30  ;;  %p622_p8 = scmp.lt.s32.totalorder %s3749_s5, 5 }
  0x34   : > { %s4911_s1 = scalar_select %p3953_p7, 1, 0 }
  0x35   : > { %p3958_p9 = pnand %p2756_p5, %p622_p8  ;;  %s3751_s23 = smov [#allocation5]  }
  0x36   : > { %4912 = sst [smem:[#allocation41_spill]] %s4911_s1  ;;  %s635_s21 = sshll.u32 %s3751_s23, 4  ;;  %s636_s21 = int_to_ptr.vmem [resolvable:$true] %s635_s21 }
  0x37   : > { %s4913_s24 = scalar_select %p3958_p9, 1, 0 }
  0x38   : > { %p4843_p10 = scmp.lt.s32.totalorder %s3749_s5, 4  ;;  %p3032_p11 = pneg %p3958_p9 }
  0x39   : > { %4914 = sst [smem:[#allocation42_spill]] %s4913_s24  ;;  %s3966_s2 = sand.u32 1, %s3717_s26  }
  0x3a   : > { %p3970_p12 = pnand %p4843_p10, %p149_p6  ;;  %p3976_p13 = pnand %p3032_p11, %p4844_p1 }
  0x3b   : > { %s3981_s19 = sand.u32 1, %s3749_s5   ;;  %s4917_s17 = sld [smem:[#allocation49_spill]] }
  0x3c   : > { %s4915_s0 = scalar_select %p3970_p12, 1, 0 }
  0x3d   : > { %s4916_s20 = scalar_select %p3976_p13, 1, 0 }
  0x3e   : > { %p4852_p3 = pneg %p3976_p13 }
  0x41   : > { %s3217_s11 = scalar_lea.hbm %s4917_s17, 64 }
  0x42   : > { %p3218_p2 = scmp.ne.s32.totalorder %s4917_s17, %s3217_s11  ;;  %p3224_p8 = scmp.lt.u32.totalorder %s3217_s11, %s4917_s17 }
  0x44   : > { %p3220_p5 = pnand %p4852_p3, %p3218_p2 }
  0x46   : > { %p3221_p6 = pneg %p3220_p5 }
  0x48   : > { %p3226_p11 = pnand %p3224_p8, %p3221_p6 }
  0x4a   : > { %3229 = shalt.err (!%p3226_p11)
}
  0x4b   : > { %s3230_s25 = scalar_lea.vmem %s636_s21, 64  ;;  %p3238_p0 = scmp.lt.s32.totalorder %s636_s21, %s636_s21 }
  0x4c   : > { %p3231_p10 = scmp.ne.s32.totalorder %s636_s21, %s3230_s25  ;;  %p3239_p7 = scmp.lt.s32.totalorder %s3230_s25, %s3230_s25 }
  0x4e   : > { %p3233_p4 = pnand %p3231_p10, %p4852_p3  ;;  %p3240_p9 = por %p3239_p7, %p3238_p0 }
  0x50   : > { %p3234_p1 = pneg %p3233_p4 }
  0x52   : > { %p3241_p12 = pnand %p3240_p9, %p3234_p1 }
  0x54   : > { %3244 = shalt.err (!%p3241_p12)
}
  0x55   : > { %3035 = dma.hbm_to_vmem [thread:$0]  (!%p3976_p13), %s4917_s17, 64, %s636_s21, [#allocation6]  }
  0x56   : > { %s4006_s11 = sshll.u32 %s3741_s4, 4  ;;  %s4918_s1 = sld [smem:[#allocation51_spill]] }
  0x57   : > { %s684_s23 = scalar_lea.vmem [#allocation8], %s3966_s2  ;;  %p4919_p1 = scmp.ne.s32.totalorder %s4915_s0, 0 }
  0x58   : > { %s691_s24 = sshll.u32 %s684_s23, 4  ;;  %s4015_s24 = int_to_ptr.vmem [resolvable:$true] %s691_s24 }
  0x59   : > { %p4022_p4 = pneg %p4919_p1 }
  0x5b   : > { %s4920_s21 = scalar_select %p4022_p4, 1, 0 }
  0x5c   : > { %s4012_s25 = scalar_lea.hbm %s4918_s1, %s4006_s11  ;;  %s3250_s17 = scalar_lea.hbm %s4918_s1, 32 }
  0x5d   : > { %s3245_s9 = scalar_lea.hbm %s4012_s25, 16  ;;  %p3251_p10 = scmp.lt.u32.totalorder %s4012_s25, %s4918_s1 }
  0x5e   : > { %p3246_p0 = scmp.ne.s32.totalorder %s4012_s25, %s3245_s9  ;;  %p3252_p12 = scmp.lt.u32.totalorder %s3250_s17, %s3245_s9 }
  0x5f   : > { %p3254_p5 = scmp.lt.u32.totalorder %s3245_s9, %s4012_s25 }
  0x60   : > { %p3248_p7 = pnand %p4022_p4, %p3246_p0  ;;  %p3253_p2 = por %p3252_p12, %p3251_p10 }
  0x62   : > { %p3249_p9 = pneg %p3248_p7  ;;  %p3255_p6 = por %p3254_p5, %p3253_p2 }
  0x64   : > { %p3256_p8 = pnand %p3255_p6, %p3249_p9 }
  0x66   : > { %3259 = shalt.err (!%p3256_p8)
}
  0x67   : > { %s3260_s7 = scalar_lea.vmem %s4015_s24, 16  ;;  %s3752_s18 = smov [#allocation8]  }
  0x68   : > { %p3261_p11 = scmp.ne.s32.totalorder %s4015_s24, %s3260_s7  ;;  %s3265_s29 = sshll.u32 %s3752_s18, 4  ;;  %s3266_s29 = int_to_ptr.vmem [resolvable:$false] %s3265_s29 }
  0x69   : > { %s3267_s16 = scalar_lea.vmem %s3266_s29, 32  ;;  %p3268_p3 = scmp.lt.s32.totalorder %s4015_s24, %s3266_s29 }
  0x6a   : > { %p3263_p0 = pnand %p3261_p11, %p4022_p4  ;;  %p3269_p13 = scmp.lt.s32.totalorder %s3267_s16, %s3260_s7 }
  0x6c   : > { %p3264_p7 = pneg %p3263_p0  ;;  %p3270_p10 = por %p3269_p13, %p3268_p3 }
  0x6e   : > { %p3271_p12 = pnand %p3270_p10, %p3264_p7 }
  0x70   : > { %3274 = shalt.err (!%p3271_p12)
}
  0x71   : > { %s4921_s17 = scalar_lea.sflag [#allocation9], %s3981_s19  ;;  %s4922_s6 = sld [smem:[#allocation54_spill]] }
  0x72   : > { %3045 = dma.hbm_to_vmem [thread:$0]  (!%p4919_p1), %s4012_s25, 16, %s4015_s24, %s4921_s17  }
  0x73   : > { %s726_s7 = scalar_lea.vmem [#allocation11], %s3966_s2 }
  0x74   : > { %s733_s29 = sshll.u32 %s726_s7, 4  ;;  %s734_s29 = int_to_ptr.vmem [resolvable:$true] %s733_s29 }
  0x77   : > { %s4051_s18 = scalar_lea.hbm %s4922_s6, %s4006_s11  ;;  %s3280_s25 = scalar_lea.hbm %s4922_s6, 32 }
  0x78   : > { %s3275_s1 = scalar_lea.hbm %s4051_s18, 16  ;;  %p3281_p2 = scmp.lt.u32.totalorder %s4051_s18, %s4922_s6 }
  0x79   : > { %p3276_p13 = scmp.ne.s32.totalorder %s4051_s18, %s3275_s1  ;;  %p3282_p5 = scmp.lt.u32.totalorder %s3280_s25, %s3275_s1 }
  0x7a   : > { %p3284_p8 = scmp.lt.u32.totalorder %s3275_s1, %s4051_s18 }
  0x7b   : > { %p3278_p3 = pnand %p3276_p13, %p4022_p4  ;;  %p3283_p6 = por %p3282_p5, %p3281_p2 }
  0x7d   : > { %p3279_p9 = pneg %p3278_p3  ;;  %p3285_p11 = por %p3284_p8, %p3283_p6 }
  0x7f   : > { %p3286_p0 = pnand %p3285_p11, %p3279_p9 }
  0x81   : > { %3289 = shalt.err (!%p3286_p0)
}
  0x82   : > { %s3290_s23 = scalar_lea.vmem %s734_s29, 16  ;;  %s3753_s7 = smov [#allocation11]  }
  0x83   : > { %p3291_p7 = scmp.ne.s32.totalorder %s734_s29, %s3290_s23  ;;  %s3295_s16 = sshll.u32 %s3753_s7, 4  ;;  %s3296_s16 = int_to_ptr.vmem [resolvable:$false] %s3295_s16 }
  0x84   : > { %s3297_s14 = scalar_lea.vmem %s3296_s16, 32  ;;  %p3298_p13 = scmp.lt.s32.totalorder %s734_s29, %s3296_s16 }
  0x85   : > { %p3293_p10 = pnand %p3291_p7, %p4022_p4  ;;  %p3299_p3 = scmp.lt.s32.totalorder %s3297_s14, %s3290_s23 }
  0x87   : > { %p3294_p12 = pneg %p3293_p10  ;;  %p3300_p1 = por %p3299_p3, %p3298_p13 }
  0x89   : > { %p3301_p2 = pnand %p3300_p1, %p3294_p12 }
  0x8b   : > { %3304 = shalt.err (!%p3301_p2)
}
  0x8c   : > { %p4923_p5 = scmp.ne.s32.totalorder %s4915_s0, 0  ;;  %s4924_s1 = scalar_lea.sflag [#allocation12], %s3981_s19 }
  0x8d   : > { %s4925_s10 = sld [smem:[#allocation58_spill]]  ;;  %s776_s16 = scalar_lea.vmem [#allocation14], %s3966_s2 }
  0x8e   : > { %3051 = dma.hbm_to_vmem [thread:$0]  (!%p4923_p5), %s4051_s18, 16, %s734_s29, %s4924_s1  }
  0x8f   : > { %s783_s9 = sshll.u32 %s776_s16, 4  ;;  %s784_s9 = int_to_ptr.vmem [resolvable:$true] %s783_s9 }
  0x93   : > { %s4078_s17 = scalar_lea.hbm %s4925_s10, %s4006_s11  ;;  %s3310_s29 = scalar_lea.hbm %s4925_s10, 32 }
  0x94   : > { %s3305_s7 = scalar_lea.hbm %s4078_s17, 16  ;;  %p3311_p8 = scmp.lt.u32.totalorder %s4078_s17, %s4925_s10 }
  0x95   : > { %p3306_p1 = scmp.ne.s32.totalorder %s4078_s17, %s3305_s7  ;;  %p3312_p11 = scmp.lt.u32.totalorder %s3310_s29, %s3305_s7 }
  0x96   : > { %p3314_p7 = scmp.lt.u32.totalorder %s3305_s7, %s4078_s17 }
  0x97   : > { %p3308_p9 = pnand %p3306_p1, %p4022_p4  ;;  %p3313_p0 = por %p3312_p11, %p3311_p8 }
  0x99   : > { %p3309_p6 = pneg %p3308_p9  ;;  %p3315_p10 = por %p3314_p7, %p3313_p0 }
  0x9b   : > { %p3316_p12 = pnand %p3315_p10, %p3309_p6 }
  0x9d   : > { %3319 = shalt.err (!%p3316_p12)
}
  0x9e   : > { %s3320_s25 = scalar_lea.vmem %s784_s9, 16  ;;  %s3754_s16 = smov [#allocation14]  }
  0x9f   : > { %p3321_p13 = scmp.ne.s32.totalorder %s784_s9, %s3320_s25  ;;  %s3325_s23 = sshll.u32 %s3754_s16, 4  ;;  %s3326_s23 = int_to_ptr.vmem [resolvable:$false] %s3325_s23 }
  0xa0   : > { %s3327_s14 = scalar_lea.vmem %s3326_s23, 32  ;;  %p3328_p1 = scmp.lt.s32.totalorder %s784_s9, %s3326_s23 }
  0xa1   : > { %p3323_p3 = pnand %p3321_p13, %p4022_p4  ;;  %p3329_p9 = scmp.lt.s32.totalorder %s3327_s14, %s3320_s25 }
  0xa3   : > { %p3324_p2 = pneg %p3323_p3  ;;  %p3330_p5 = por %p3329_p9, %p3328_p1 }
  0xa5   : > { %p3331_p8 = pnand %p3330_p5, %p3324_p2 }
  0xa7   : > { %3334 = shalt.err (!%p3331_p8)
}
  0xa8   : > { %p4926_p11 = scmp.ne.s32.totalorder %s4915_s0, 0  ;;  %s4927_s7 = scalar_lea.sflag [#allocation15], %s3981_s19 }
  0xa9   : > { %s4928_s13 = sld [smem:[#allocation61_spill]]  ;;  %s818_s23 = scalar_lea.vmem [#allocation17], %s3966_s2 }
  0xaa   : > { %3057 = dma.hbm_to_vmem [thread:$0]  (!%p4926_p11), %s4078_s17, 16, %s784_s9, %s4927_s7  }
  0xab   : > { %s825_s24 = sshll.u32 %s818_s23, 4  ;;  %s2770_s25 = sshll.u32 %s3966_s2, 4  ;;  %s4108_s24 = int_to_ptr.vmem [resolvable:$true] %s825_s24 }
  0xac   : > { %s4858_s16 = scalar_lea.sflag [#allocation18], %s3981_s19 }
  0xaf   : > { %s4105_s1 = scalar_lea.hbm %s4928_s13, %s4006_s11  ;;  %s3340_s7 = scalar_lea.hbm %s4928_s13, 32 }
  0xb0   : > { %s3335_s14 = scalar_lea.hbm %s4105_s1, 16  ;;  %p3341_p7 = scmp.lt.u32.totalorder %s4105_s1, %s4928_s13 }
  0xb1   : > { %p3336_p5 = scmp.ne.s32.totalorder %s4105_s1, %s3335_s14  ;;  %p3342_p10 = scmp.lt.u32.totalorder %s3340_s7, %s3335_s14 }
  0xb2   : > { %p3344_p13 = scmp.lt.u32.totalorder %s3335_s14, %s4105_s1 }
  0xb3   : > { %p3338_p6 = pnand %p3336_p5, %p4022_p4  ;;  %p3343_p12 = por %p3342_p10, %p3341_p7 }
  0xb5   : > { %p3339_p0 = pneg %p3338_p6  ;;  %p3345_p3 = por %p3344_p13, %p3343_p12 }
  0xb7   : > { %p3346_p2 = pnand %p3345_p3, %p3339_p0 }
  0xb9   : > { %3349 = shalt.err (!%p3346_p2)
}
  0xba   : > { %s3350_s23 = scalar_lea.vmem %s4108_s24, 16  ;;  %s3755_s17 = smov [#allocation17]  }
  0xbb   : > { %p3351_p1 = scmp.ne.s32.totalorder %s4108_s24, %s3350_s23  ;;  %s3355_s9 = sshll.u32 %s3755_s17, 4  ;;  %s3356_s9 = int_to_ptr.vmem [resolvable:$false] %s3355_s9 }
  0xbc   : > { %s3357_s18 = scalar_lea.vmem %s3356_s9, 32  ;;  %p3358_p5 = scmp.lt.s32.totalorder %s4108_s24, %s3356_s9 }
  0xbd   : > { %p3353_p9 = pnand %p3351_p1, %p4022_p4  ;;  %p3359_p6 = scmp.lt.s32.totalorder %s3357_s18, %s3350_s23 }
  0xbf   : > { %p3354_p8 = pneg %p3353_p9  ;;  %p3360_p7 = por %p3359_p6, %p3358_p5 }
  0xc1   : > { %p3361_p10 = pnand %p3360_p7, %p3354_p8 }
  0xc3   : > { %3364 = shalt.err (!%p3361_p10)
}
  0xc4   : > { %3063 = dma.hbm_to_vmem [thread:$0]  (!%p4926_p11), %s4105_s1, 16, %s4108_s24, %s4858_s16  }
  0xc5   : > { %s2837_s14 = sshll.u32 %s3741_s4, 8  ;;  %s4929_s15 = sld [smem:[#allocation63_spill]] }
  0xc6   : > { %s853_s23 = scalar_lea.vmem [#allocation20], %s2770_s25  ;;  %s4862_s18 = scalar_lea.sflag [#allocation21], %s3981_s19 }
  0xc7   : > { %s860_s9 = sshll.u32 %s853_s23, 4  ;;  %s4143_s9 = int_to_ptr.vmem [resolvable:$true] %s860_s9 }
  0xcb   : > { %s4139_s17 = scalar_lea.hbm %s4929_s15, %s2837_s14  ;;  %s3370_s14 = scalar_lea.hbm %s4929_s15, 512 }
  0xcc   : > { %s3365_s6 = scalar_lea.hbm %s4139_s17, 256  ;;  %p3371_p3 = scmp.lt.u32.totalorder %s4139_s17, %s4929_s15 }
  0xcd   : > { %p3366_p0 = scmp.ne.s32.totalorder %s4139_s17, %s3365_s6  ;;  %p3372_p2 = scmp.lt.u32.totalorder %s3370_s14, %s3365_s6 }
  0xce   : > { %p3374_p9 = scmp.lt.u32.totalorder %s3365_s6, %s4139_s17 }
  0xcf   : > { %p3368_p12 = pnand %p3366_p0, %p4022_p4  ;;  %p3373_p1 = por %p3372_p2, %p3371_p3 }
  0xd1   : > { %p3369_p13 = pneg %p3368_p12  ;;  %p3375_p8 = por %p3374_p9, %p3373_p1 }
  0xd3   : > { %p3376_p5 = pnand %p3375_p8, %p3369_p13 }
  0xd5   : > { %3379 = shalt.err (!%p3376_p5)
}
  0xd6   : > { %s3380_s25 = scalar_lea.vmem %s4143_s9, 256  ;;  %s3756_s23 = smov [#allocation20]  }
  0xd7   : > { %p3381_p6 = scmp.ne.s32.totalorder %s4143_s9, %s3380_s25  ;;  %s3385_s1 = sshll.u32 %s3756_s23, 4  ;;  %s3386_s1 = int_to_ptr.vmem [resolvable:$false] %s3385_s1 }
  0xd8   : > { %s3387_s24 = scalar_lea.vmem %s3386_s1, 512  ;;  %p3388_p0 = scmp.lt.s32.totalorder %s4143_s9, %s3386_s1 }
  0xd9   : > { %p3383_p7 = pnand %p3381_p6, %p4022_p4  ;;  %p3389_p12 = scmp.lt.s32.totalorder %s3387_s24, %s3380_s25 }
  0xdb   : > { %p3384_p10 = pneg %p3383_p7  ;;  %p3390_p3 = por %p3389_p12, %p3388_p0 }
  0xdd   : > { %p3391_p2 = pnand %p3390_p3, %p3384_p10 }
  0xdf   : > { %3394 = shalt.err (!%p3391_p2)
}
  0xe0   : > { %s3757_s6 = smov 64   ;;  %s3758_s14 = smov 4  }
  0xe1   : > { %3069 = dma.hbm_to_vmem [thread:$0]  (!%p4926_p11), %s4139_s17, 256, %s4143_s9, %s4862_s18, %s3757_s6, %s3757_s6, %s3758_s14  }
  0xe2   : > { %s3759_s7 = smov [#allocation7]   ;;  %s4930_s1 = sld [smem:[#allocation50_spill]] }
  0xe3   : > { %s646_s29 = sshll.u32 %s3759_s7, 4  ;;  %p4931_p1 = scmp.ne.s32.totalorder %s4916_s20, 0  ;;  %s647_s29 = int_to_ptr.vmem [resolvable:$true] %s646_s29 }
  0xe5   : > { %p4932_p9 = pneg %p4931_p1 }
  0xe8   : > { %s3395_s25 = scalar_lea.hbm %s4930_s1, 64 }
  0xe9   : > { %p3396_p13 = scmp.ne.s32.totalorder %s4930_s1, %s3395_s25  ;;  %p3402_p6 = scmp.lt.u32.totalorder %s3395_s25, %s4930_s1 }
  0xeb   : > { %p3398_p8 = pnand %p3396_p13, %p4932_p9 }
  0xed   : > { %p3399_p5 = pneg %p3398_p8 }
  0xef   : > { %p3404_p7 = pnand %p3402_p6, %p3399_p5 }
  0xf1   : > { %3407 = shalt.err (!%p3404_p7)
}
  0xf2   : > { %s3408_s17 = scalar_lea.vmem %s647_s29, 64  ;;  %p4933_p0 = pmov %p4932_p9 }
  0xf3   : > { %p3409_p10 = scmp.ne.s32.totalorder %s647_s29, %s3408_s17  ;;  %p3416_p2 = scmp.lt.s32.totalorder %s647_s29, %s647_s29 }
  0xf4   : > { %p3417_p11 = scmp.lt.s32.totalorder %s3408_s17, %s3408_s17 }
  0xf5   : > { %p3411_p12 = pnand %p3409_p10, %p4933_p0 }
  0xf6   : > { %p3418_p4 = por %p3417_p11, %p3416_p2 }
  0xf7   : > { %p3412_p3 = pneg %p3411_p12 }
  0xf9   : > { %p3419_p9 = pnand %p3418_p4, %p3412_p3 }
  0xfb   : > { %3422 = shalt.err (!%p3419_p9)
}
  0xfc   : > { %3038 = dma.hbm_to_vmem [thread:$0]  (!%p4931_p1), %s4930_s1, 64, %s647_s29, [#allocation6]  }
  0xfd   : > { %s2755_s13 = sadd.s32 4294967294, %s3749_s5   ;;  %s62_s15 = sadd.s32 1, %s3741_s4 }
  0xfe   : > { %p63_p4 = scmp.ge.s32.totalorder %s62_s15, 2  ;;  %s65_s20 = sadd.s32 1, %s3745_s30 }
  0xff   : > { %s72_s9 = sadd.s32 1, %s3729_s28  ;;  %p79_p11 = scmp.ne.s32.totalorder %s3729_s28, %s3725_s3 }
 0x100   : > { %s5012_s15 = smov (%p63_p4, %s62_s15), 0  ;;  %s5014_s20 = smov (!%p63_p4, %s65_s20), %s3745_s30 }
 0x101   : > { %4934 = sst [smem:[#allocation43_spill]] %s5012_s15  ;;  %p4935_p13 = scmp.eq.s32.totalorder %s3749_s5, 0 }
 0x102   : > { %p85_p8 = scmp.ne.s32.totalorder %s3725_s3, %s3721_s27  ;;  %p67_p5 = scmp.ge.s32.totalorder %s5014_s20, 2 }
 0x103   : > { %p4200_p1 = por %p4935_p13, %p79_p11  ;;  %s137_s14 = ssub.s32 %s3741_s4, %s5012_s15 }
 0x104   : > { %p4937_p6 = scmp.eq.s32.totalorder %s3939_s22, 0  ;;  %p138_p10 = scmp.eq.s32.totalorder %s137_s14, 0 }
 0x105   : > { %s5016_s20 = smov (%p67_p5, %s5014_s20), 0  ;;  %s4940_s29 = sadd.s32 1, %s3717_s26 }
 0x106   : > { %p4213_p7 = por %p4937_p6, %p85_p8  ;;  %4939 = sst [smem:[#allocation44_spill]] %s5016_s20 }
 0x107   : > { %s4222_s23 = scalar_select %p138_p10, %s3717_s26, %s4940_s29  }
 0x108   : > { %s4938_s7 = scalar_select %p4213_p7, 1, 0 }
 0x109   : > { %4941 = sst [smem:[#allocation45_spill]] %s4222_s23  ;;  %s69_s25 = ssub.s32 %s3745_s30, %s5016_s20 }
 0x10a   : > { %p4942_p0 = scmp.eq.s32.totalorder %s3939_s22, 3  ;;  %p70_p3 = scmp.eq.s32.totalorder %s69_s25, 0 }
 0x10b   : > { %p615_p2 = scmp.eq.s32.totalorder %s2755_s13, 3  ;;  %s663_s17 = sand.u32 1, %s3729_s28  }
 0x10c   : > { %p4228_p12 = por %p4942_p0, %p79_p11  ;;  %s2761_s10 = sshll.u32 %s3745_s30, 7 }
 0x10d   : > { %s4235_s16 = scalar_select %p70_p3, %s3729_s28, %s72_s9  }
 0x10e   : > { %s4943_s24 = scalar_select %p4228_p12, 1, 0 }
 0x10f   : > { %4944 = sst [smem:[#allocation46_spill]] %s4235_s16  ;;  %p4240_p9 = por %p615_p2, %p85_p8 }
 0x110   : > { %s2760_s18 = sshll.u32 %s663_s17, 3  ;;  %s4947_s20 = sld [smem:[#allocation48_spill]] }
 0x111   : > { %s4945_s14 = scalar_select %p4240_p9, 1, 0 }
 0x112   : > { %p4948_p4 = scmp.lt.s32.totalorder %s3749_s5, 4  ;;  %s667_s9 = scalar_lea.vmem [#allocation2], %s2760_s18 }
 0x113   : > { %4946 = sst [smem:[#allocation47_spill]] %s4945_s14  ;;  %s674_s25 = sshll.u32 %s667_s9, 4  ;;  %s4257_s25 = int_to_ptr.vmem [resolvable:$true] %s674_s25 }
 0x114   : > { %p4253_p11 = pnand %p4948_p4, %p4200_p1  ;;  %s664_s30 = scalar_lea.sflag [#allocation3], %s663_s17 }
 0x116   : > { %s4247_s15 = scalar_lea.hbm %s4947_s20, %s2761_s10  ;;  %p3425_p8 = pneg %p4253_p11 }
 0x117   : > { %s3423_s1 = scalar_lea.hbm %s4247_s15, 128  ;;  %s3428_s29 = scalar_lea.hbm %s4947_s20, 256 }
 0x118   : > { %p3424_p13 = scmp.ne.s32.totalorder %s4247_s15, %s3423_s1  ;;  %p3429_p1 = scmp.lt.u32.totalorder %s4247_s15, %s4947_s20 }
 0x119   : > { %p3430_p10 = scmp.lt.u32.totalorder %s3428_s29, %s3423_s1  ;;  %p3432_p3 = scmp.lt.u32.totalorder %s3423_s1, %s4247_s15 }
 0x11a   : > { %p3426_p5 = pnand %p3425_p8, %p3424_p13 }
 0x11b   : > { %p3431_p0 = por %p3430_p10, %p3429_p1 }
 0x11c   : > { %p3427_p6 = pneg %p3426_p5 }
 0x11d   : > { %p3433_p2 = por %p3432_p3, %p3431_p0 }
 0x11f   : > { %p3434_p4 = pnand %p3433_p2, %p3427_p6 }
 0x121   : > { %3437 = shalt.err (!%p3434_p4)
}
 0x122   : > { %s3438_s18 = scalar_lea.vmem %s4257_s25, 128  ;;  %s3760_s17 = smov [#allocation2]  }
 0x123   : > { %p3439_p13 = scmp.ne.s32.totalorder %s4257_s25, %s3438_s18  ;;  %s3443_s9 = sshll.u32 %s3760_s17, 4  ;;  %s3444_s9 = int_to_ptr.vmem [resolvable:$false] %s3443_s9 }
 0x124   : > { %s3445_s4 = scalar_lea.vmem %s3444_s9, 256  ;;  %p3446_p12 = scmp.lt.s32.totalorder %s4257_s25, %s3444_s9 }
 0x125   : > { %p3441_p5 = pnand %p3439_p13, %p3425_p8  ;;  %p3447_p1 = scmp.lt.s32.totalorder %s3445_s4, %s3438_s18 }
 0x127   : > { %p3442_p9 = pneg %p3441_p5  ;;  %p3448_p10 = por %p3447_p1, %p3446_p12 }
 0x129   : > { %p3449_p0 = pnand %p3448_p10, %p3442_p9 }
 0x12b   : > { %3452 = shalt.err (!%p3449_p0)
}
 0x12c   : > { %3042 = dma.hbm_to_vmem [thread:$0]  (!%p4253_p11), %s4247_s15, 128, %s4257_s25, %s664_s30  }
 0x12d   : > { %s4950_s6 = sld [smem:[#allocation52_spill]]  ;;  %s701_s29 = scalar_lea.vmem [#allocation10], %s3966_s2 }
 0x12e   : > { %s708_s18 = sshll.u32 %s701_s29, 4  ;;  %p4951_p9 = scmp.ne.s32.totalorder %s4920_s21, 0  ;;  %s709_s18 = int_to_ptr.vmem [resolvable:$true] %s708_s18 }
 0x133   : > { %s4288_s10 = scalar_lea.hbm %s4950_s6, %s4006_s11  ;;  %s3458_s30 = scalar_lea.hbm %s4950_s6, 32 }
 0x134   : > { %s3453_s17 = scalar_lea.hbm %s4288_s10, 16  ;;  %p3459_p11 = scmp.lt.u32.totalorder %s4288_s10, %s4950_s6 }
 0x135   : > { %p3454_p12 = scmp.ne.s32.totalorder %s4288_s10, %s3453_s17  ;;  %p3460_p3 = scmp.lt.u32.totalorder %s3458_s30, %s3453_s17 }
 0x136   : > { %p3462_p4 = scmp.lt.u32.totalorder %s3453_s17, %s4288_s10 }
 0x137   : > { %p3456_p8 = pnand %p3454_p12, %p4951_p9  ;;  %p3461_p2 = por %p3460_p3, %p3459_p11 }
 0x139   : > { %p3457_p6 = pneg %p3456_p8  ;;  %p3463_p13 = por %p3462_p4, %p3461_p2 }
 0x13b   : > { %p3464_p5 = pnand %p3463_p13, %p3457_p6 }
 0x13d   : > { %3467 = shalt.err (!%p3464_p5)
}
 0x13e   : > { %s3468_s4 = scalar_lea.vmem %s709_s18, 16  ;;  %s3761_s16 = smov [#allocation10]  }
 0x13f   : > { %p3469_p1 = scmp.ne.s32.totalorder %s709_s18, %s3468_s4  ;;  %s3473_s1 = sshll.u32 %s3761_s16, 4  ;;  %s3474_s1 = int_to_ptr.vmem [resolvable:$false] %s3473_s1 }
 0x140   : > { %s3475_s29 = scalar_lea.vmem %s3474_s1, 32  ;;  %p3476_p12 = scmp.lt.s32.totalorder %s709_s18, %s3474_s1 }
 0x141   : > { %p3471_p10 = pnand %p3469_p1, %p4951_p9  ;;  %p3477_p8 = scmp.lt.s32.totalorder %s3475_s29, %s3468_s4 }
 0x143   : > { %p3472_p0 = pneg %p3471_p10  ;;  %p3478_p7 = por %p3477_p8, %p3476_p12 }
 0x145   : > { %p3479_p3 = pnand %p3478_p7, %p3472_p0 }
 0x147   : > { %3482 = shalt.err (!%p3479_p3)
}
 0x148   : > { %p4952_p11 = scmp.ne.s32.totalorder %s4915_s0, 0  ;;  %s4953_s17 = scalar_lea.sflag [#allocation9], %s3981_s19 }
 0x149   : > { %s4954_s8 = sld [smem:[#allocation56_spill]]  ;;  %s751_s15 = scalar_lea.vmem [#allocation13], %s3966_s2 }
 0x14a   : > { %3048 = dma.hbm_to_vmem [thread:$0]  (!%p4952_p11), %s4288_s10, 16, %s709_s18, %s4953_s17  }
 0x14b   : > { %s758_s25 = sshll.u32 %s751_s15, 4  ;;  %s759_s25 = int_to_ptr.vmem [resolvable:$true] %s758_s25 }
 0x14f   : > { %s4314_s30 = scalar_lea.hbm %s4954_s8, %s4006_s11  ;;  %s3488_s10 = scalar_lea.hbm %s4954_s8, 32 }
 0x150   : > { %s3483_s4 = scalar_lea.hbm %s4314_s30, 16  ;;  %p3489_p4 = scmp.lt.u32.totalorder %s4314_s30, %s4954_s8 }
 0x151   : > { %p3484_p7 = scmp.ne.s32.totalorder %s4314_s30, %s3483_s4  ;;  %p3490_p13 = scmp.lt.u32.totalorder %s3488_s10, %s3483_s4 }
 0x152   : > { %p3492_p1 = scmp.lt.u32.totalorder %s3483_s4, %s4314_s30 }
 0x153   : > { %p3486_p6 = pnand %p3484_p7, %p4951_p9  ;;  %p3491_p5 = por %p3490_p13, %p3489_p4 }
 0x155   : > { %p3487_p2 = pneg %p3486_p6  ;;  %p3493_p10 = por %p3492_p1, %p3491_p5 }
 0x157   : > { %p3494_p0 = pnand %p3493_p10, %p3487_p2 }
 0x159   : > { %3497 = shalt.err (!%p3494_p0)
}
 0x15a   : > { %s3498_s17 = scalar_lea.vmem %s759_s25, 16  ;;  %s3762_s13 = smov [#allocation13]  }
 0x15b   : > { %p3499_p12 = scmp.ne.s32.totalorder %s759_s25, %s3498_s17  ;;  %s3503_s9 = sshll.u32 %s3762_s13, 4  ;;  %s3504_s9 = int_to_ptr.vmem [resolvable:$false] %s3503_s9 }
 0x15c   : > { %s3505_s15 = scalar_lea.vmem %s3504_s9, 32  ;;  %p3506_p7 = scmp.lt.s32.totalorder %s759_s25, %s3504_s9 }
 0x15d   : > { %p3501_p8 = pnand %p3499_p12, %p4951_p9  ;;  %p3507_p6 = scmp.lt.s32.totalorder %s3505_s15, %s3498_s17 }
 0x15f   : > { %p3502_p3 = pneg %p3501_p8  ;;  %p3508_p11 = por %p3507_p6, %p3506_p7 }
 0x161   : > { %p3509_p4 = pnand %p3508_p11, %p3502_p3 }
 0x163   : > { %3512 = shalt.err (!%p3509_p4)
}
 0x164   : > { %p4955_p13 = scmp.ne.s32.totalorder %s4915_s0, 0  ;;  %s4956_s4 = scalar_lea.sflag [#allocation12], %s3981_s19 }
 0x165   : > { %s4957_s12 = sld [smem:[#allocation60_spill]]  ;;  %s801_s18 = scalar_lea.vmem [#allocation16], %s3966_s2 }
 0x166   : > { %3054 = dma.hbm_to_vmem [thread:$0]  (!%p4955_p13), %s4314_s30, 16, %s759_s25, %s4956_s4  }
 0x167   : > { %s808_s29 = sshll.u32 %s801_s18, 4  ;;  %s809_s29 = int_to_ptr.vmem [resolvable:$true] %s808_s29 }
 0x16b   : > { %s4340_s10 = scalar_lea.hbm %s4957_s12, %s4006_s11  ;;  %s3518_s30 = scalar_lea.hbm %s4957_s12, 32 }
 0x16c   : > { %s3513_s17 = scalar_lea.hbm %s4340_s10, 16  ;;  %p3519_p1 = scmp.lt.u32.totalorder %s4340_s10, %s4957_s12 }
 0x16d   : > { %p3514_p11 = scmp.ne.s32.totalorder %s4340_s10, %s3513_s17  ;;  %p3520_p10 = scmp.lt.u32.totalorder %s3518_s30, %s3513_s17 }
 0x16e   : > { %p3522_p12 = scmp.lt.u32.totalorder %s3513_s17, %s4340_s10 }
 0x16f   : > { %p3516_p2 = pnand %p3514_p11, %p4951_p9  ;;  %p3521_p0 = por %p3520_p10, %p3519_p1 }
 0x171   : > { %p3517_p5 = pneg %p3516_p2  ;;  %p3523_p8 = por %p3522_p12, %p3521_p0 }
 0x173   : > { %p3524_p3 = pnand %p3523_p8, %p3517_p5 }
 0x175   : > { %3527 = shalt.err (!%p3524_p3)
}
 0x176   : > { %s3528_s4 = scalar_lea.vmem %s809_s29, 16  ;;  %s3763_s16 = smov [#allocation16]  }
 0x177   : > { %p3529_p7 = scmp.ne.s32.totalorder %s809_s29, %s3528_s4  ;;  %s3533_s1 = sshll.u32 %s3763_s16, 4  ;;  %s3534_s1 = int_to_ptr.vmem [resolvable:$false] %s3533_s1 }
 0x178   : > { %s3535_s18 = scalar_lea.vmem %s3534_s1, 32  ;;  %p3536_p11 = scmp.lt.s32.totalorder %s809_s29, %s3534_s1 }
 0x179   : > { %p3531_p6 = pnand %p3529_p7, %p4951_p9  ;;  %p3537_p2 = scmp.lt.s32.totalorder %s3535_s18, %s3528_s4 }
 0x17b   : > { %p3532_p4 = pneg %p3531_p6  ;;  %p3538_p13 = por %p3537_p2, %p3536_p11 }
 0x17d   : > { %p3539_p1 = pnand %p3538_p13, %p3532_p4 }
 0x17f   : > { %3542 = shalt.err (!%p3539_p1)
}
 0x180   : > { %p4958_p10 = scmp.ne.s32.totalorder %s4915_s0, 0  ;;  %s4959_s17 = scalar_lea.sflag [#allocation15], %s3981_s19 }
 0x181   : > { %s4960_s30 = sld [smem:[#allocation62_spill]]  ;;  %s835_s4 = scalar_lea.vmem [#allocation19], %s3966_s2 }
 0x182   : > { %3060 = dma.hbm_to_vmem [thread:$0]  (!%p4958_p10), %s4340_s10, 16, %s809_s29, %s4959_s17  }
 0x183   : > { %s842_s16 = sshll.u32 %s835_s4, 4  ;;  %s843_s16 = int_to_ptr.vmem [resolvable:$true] %s842_s16 }
 0x187   : > { %s4961_s15 = smov %s4960_s30  ;;  %s4366_s25 = scalar_lea.hbm %s4960_s30, %s4006_s11 }
 0x188   : > { %s3543_s1 = scalar_lea.hbm %s4366_s25, 16  ;;  %s3548_s10 = scalar_lea.hbm %s4961_s15, 32 }
 0x189   : > { %p3544_p13 = scmp.ne.s32.totalorder %s4366_s25, %s3543_s1  ;;  %p3549_p12 = scmp.lt.u32.totalorder %s4366_s25, %s4961_s15 }
 0x18a   : > { %p3550_p8 = scmp.lt.u32.totalorder %s3548_s10, %s3543_s1  ;;  %p3552_p7 = scmp.lt.u32.totalorder %s3543_s1, %s4366_s25 }
 0x18b   : > { %p3546_p5 = pnand %p3544_p13, %p4951_p9 }
 0x18c   : > { %p3551_p3 = por %p3550_p8, %p3549_p12 }
 0x18d   : > { %p3547_p0 = pneg %p3546_p5 }
 0x18e   : > { %p3553_p6 = por %p3552_p7, %p3551_p3 }
 0x190   : > { %p3554_p4 = pnand %p3553_p6, %p3547_p0 }
 0x192   : > { %3557 = shalt.err (!%p3554_p4)
}
 0x193   : > { %s3558_s13 = scalar_lea.vmem %s843_s16, 16  ;;  %s3764_s9 = smov [#allocation19]  }
 0x194   : > { %p3559_p11 = scmp.ne.s32.totalorder %s843_s16, %s3558_s13  ;;  %s3563_s30 = sshll.u32 %s3764_s9, 4  ;;  %s3564_s30 = int_to_ptr.vmem [resolvable:$false] %s3563_s30 }
 0x195   : > { %s3565_s6 = scalar_lea.vmem %s3564_s30, 32  ;;  %p3566_p13 = scmp.lt.s32.totalorder %s843_s16, %s3564_s30 }
 0x196   : > { %p3561_p2 = pnand %p3559_p11, %p4951_p9  ;;  %p3567_p5 = scmp.lt.s32.totalorder %s3565_s6, %s3558_s13 }
 0x198   : > { %p3562_p1 = pneg %p3561_p2  ;;  %p3568_p10 = por %p3567_p5, %p3566_p13 }
 0x19a   : > { %p3569_p8 = pnand %p3568_p10, %p3562_p1 }
 0x19c   : > { %3572 = shalt.err (!%p3569_p8)
}
 0x19d   : > { %p4962_p12 = scmp.ne.s32.totalorder %s4915_s0, 0  ;;  %s4963_s4 = scalar_lea.sflag [#allocation18], %s3981_s19 }
 0x19e   : > { %s4964_s10 = sld [smem:[#allocation64_spill]]  ;;  %s873_s17 = scalar_lea.vmem [#allocation22], %s3966_s2 }
 0x19f   : > { %3066 = dma.hbm_to_vmem [thread:$0]  (!%p4962_p12), %s4366_s25, 16, %s843_s16, %s4963_s4  }
 0x1a0   : > { %s880_s13 = sshll.u32 %s873_s17, 4  ;;  %s881_s13 = int_to_ptr.vmem [resolvable:$true] %s880_s13 }
 0x1a4   : > { %s4392_s29 = scalar_lea.hbm %s4964_s10, %s4006_s11  ;;  %s3578_s25 = scalar_lea.hbm %s4964_s10, 32 }
 0x1a5   : > { %s3573_s9 = scalar_lea.hbm %s4392_s29, 16  ;;  %p3579_p7 = scmp.lt.u32.totalorder %s4392_s29, %s4964_s10 }
 0x1a6   : > { %p3574_p10 = scmp.ne.s32.totalorder %s4392_s29, %s3573_s9  ;;  %p3580_p6 = scmp.lt.u32.totalorder %s3578_s25, %s3573_s9 }
 0x1a7   : > { %p3582_p11 = scmp.lt.u32.totalorder %s3573_s9, %s4392_s29 }
 0x1a8   : > { %p3576_p0 = pnand %p3574_p10, %p4951_p9  ;;  %p3581_p4 = por %p3580_p6, %p3579_p7 }
 0x1aa   : > { %p3577_p3 = pneg %p3576_p0  ;;  %p3583_p2 = por %p3582_p11, %p3581_p4 }
 0x1ac   : > { %p3584_p1 = pnand %p3583_p2, %p3577_p3 }
 0x1ae   : > { %3587 = shalt.err (!%p3584_p1)
}
 0x1af   : > { %s3588_s2 = scalar_lea.vmem %s881_s13, 16  ;;  %s3765_s11 = smov [#allocation22]  }
 0x1b0   : > { %p3589_p13 = scmp.ne.s32.totalorder %s881_s13, %s3588_s2  ;;  %s3593_s1 = sshll.u32 %s3765_s11, 4  ;;  %s3594_s1 = int_to_ptr.vmem [resolvable:$false] %s3593_s1 }
 0x1b1   : > { %s3595_s18 = scalar_lea.vmem %s3594_s1, 32  ;;  %p3596_p10 = scmp.lt.s32.totalorder %s881_s13, %s3594_s1 }
 0x1b2   : > { %p3591_p5 = pnand %p3589_p13, %p4951_p9  ;;  %p3597_p0 = scmp.lt.s32.totalorder %s3595_s18, %s3588_s2 }
 0x1b4   : > { %p3592_p8 = pneg %p3591_p5  ;;  %p3598_p12 = por %p3597_p0, %p3596_p10 }
 0x1b6   : > { %p3599_p6 = pnand %p3598_p12, %p3592_p8 }
 0x1b8   : > { %3602 = shalt.err (!%p3599_p6)
}
 0x1b9   : > { %p4965_p7 = scmp.ne.s32.totalorder %s4915_s0, 0  ;;  %s4966_s17 = scalar_lea.sflag [#allocation21], %s3981_s19 }
 0x1ba   : > { %s4967_s9 = sld [smem:[#allocation42_spill]] }
 0x1bb   : > { %3072 = dma.hbm_to_vmem [thread:$0]  (!%p4965_p7), %s4392_s29, 16, %s881_s13, %s4966_s17  }
 0x1c0   : > { %p4968_p3 = scmp.ne.s32.totalorder %s4967_s9, 0 }
 0x1c1   : > { %s4417_s21 = sand.u32 (!%p4968_p3), 1, %s3725_s3   ;;  %p4969_p9 = scmp.ne.s32.totalorder (!%p4968_p3), %s4938_s7, 0 }
 0x1c2   : > { %903 = sbr.rel (%p4968_p3) target bundleno = 3394 (0xd42), region = 104  ;;  %s4871_s30 = sshll.u32 (!%p4968_p3), %s4417_s21, 3 }
 0x1c3   : > { %s906_s6 = scalar_lea.sflag (!%p4968_p3), [#allocation3], %s4417_s21  ;;  %s4423_s25 = scalar_lea.vmem (!%p4968_p3), [#allocation2], %s4871_s30 }
 0x1c9   : > { %3676 = dma.done.wait (%p4969_p9), %s906_s6, 128  }
 0x1ca   : > { %3678 = vsyncadd (%p4969_p9), %s906_s6, 4294967168  ;;  %p4970_p12 = scmp.eq.s32.totalorder %s3939_s22, 0 }
 0x1cc   : > { %3680 = dma.done.wait (%p4970_p12), [#allocation6], 128   ;;  %p4971_p4 = pmov %p4970_p12 }
 0x1cd   : > { %s4972_s19 = sld [smem:[#allocation32_spill]]  ;;  %s4973_s0 = sld [smem:[#allocation41_spill]] }
 0x1ce   : > { %3682 = vsyncadd (%p4971_p4), [#allocation6], 4294967168  ;;  %s922_s29 = sand.u32 1, %s3939_s22  }
 0x1cf   : > { %s923_s16 = scalar_lea.sflag [#allocation9], %s922_s29 }
 0x1d3   : > { %s4435_s13 = sand.u32 1, %s4972_s19   ;;  %p4974_p11 = scmp.ne.s32.totalorder %s4973_s0, 0 }
 0x1d5   : > { %3684 = dma.done.wait (%p4974_p11), %s923_s16, 32  }
 0x1d6   : > { %3686 = vsyncadd (%p4974_p11), %s923_s16, 4294967264  ;;  %s939_s2 = scalar_lea.sflag [#allocation12], %s922_s29 }
 0x1d7   : > { %3688 = dma.done.wait (%p4974_p11), %s939_s2, 32  }
 0x1d8   : > { %3690 = vsyncadd (%p4974_p11), %s939_s2, 4294967264  ;;  %s955_s1 = scalar_lea.sflag [#allocation15], %s922_s29 }
 0x1d9   : > { %3692 = dma.done.wait (%p4974_p11), %s955_s1, 32  }
 0x1da   : > { %3694 = vsyncadd (%p4974_p11), %s955_s1, 4294967264  ;;  %s971_s9 = scalar_lea.sflag [#allocation18], %s922_s29 }
 0x1db   : > { %3696 = dma.done.wait (%p4974_p11), %s971_s9, 32  }
 0x1dc   : > { %3698 = vsyncadd (%p4974_p11), %s971_s9, 4294967264  ;;  %s2778_s19 = sshll.u32 %s4435_s13, 4  ;;  %s987_s2 = scalar_lea.sflag [#allocation21], %s922_s29 }
 0x1dd   : > { %s4462_s18 = scalar_lea.vmem [#allocation20], %s2778_s19 }
 0x1de   : > { %3700 = dma.done.wait (%p4974_p11), %s987_s2, 272  }
 0x1df   : > { %3702 = vsyncadd (%p4974_p11), %s987_s2, 4294967024  ;;  %s4975_s1 = sld [smem:[#allocation37_spill]]  ;;  %s4976_s17 = sld [smem:[#allocation53_spill]] }
 0x1e0   : > { %s4977_s2 = sld [smem:[#allocation55_spill]]  ;;  %s4978_s8 = sld [smem:[#allocation57_spill]] }
 0x1e1   : > { %s4979_s20 = sld [smem:[#allocation59_spill]]  ;;  %s4980_s29 = sld [smem:[#allocation65_spill]] }
 0x1e2   : > { %s4981_s22 = sld [smem:[#allocation66_spill]]  ;;  %s4982_s14 = sshll.u32 %s4417_s21, 3 }
 0x1e3   : > { %s4506_s27 = scalar_lea.vmem [#allocation23], %s4982_s14 }
 0x1e5   : > { %p1126_p2 = scmp.lt.s32.totalorder %s4975_s1, 1  ;;  %p2790_p1 = scmp.ne.s32.totalorder %s4975_s1, 0 }
 0x1e6   : > { %v1159_v0 = vld [vmem:[%s4423_s25] sm:$0xff] (!%p2790_p1)  ;;  %vm1160_vm0 = vcmask (!%p2790_p1), 261120  }
 0x1e7   : > { %s4470_s6 = scalar_select %p1126_p2, %s4975_s1, 1 }
 0x1e8   : > { %1158 = sbr.rel (%p2790_p1) target bundleno = 495 (0x1ef), region = 160  ;;  %1161 = vst.msk [vmem:[%s4506_s27] sm:$0xff] (!%p2790_p1), %vm1160_vm0, %v1159_v0 }
 0x1e9   : > { %s2838_s9 = sshll.u32 %s4470_s6, 4  ;;  %s2842_s16 = sshll.u32 %s4470_s6, 5 }
 0x1ea   : > { %s4477_s11 = scalar_lea.vmem %s4976_s17, %s2838_s9  ;;  %s4482_s7 = scalar_lea.vmem %s4977_s2, %s2838_s9 }
 0x1eb   : > { %s4487_s10 = scalar_lea.vmem %s4978_s8, %s2838_s9  ;;  %s4492_s28 = scalar_lea.vmem %s4979_s20, %s2838_s9 }
 0x1ec   : > { %s4497_s17 = scalar_lea.vmem %s4980_s29, %s2842_s16  ;;  %s1153_s0 = scalar_lea.vmem %s4981_s22, %s4470_s6 }
 0x1ed   : > { %s998_s2 = scalar_lea.vmem [#allocation22], %s4435_s13 }
 0x1ef PF: > { %v4512_v1 = vld [vmem:[%s4506_s27] sm:$0xff]  ;;  %vm1171_vm1 = vcmask 261120   ;;  %v3183_v8 = vld [vmem:[%s4477_s11] sm:$0xff]   ;;  %v3766_v10 = vmov 0.0   ;;  %vm3767_vm2 = vmmov 0   ;;  %s4983_s8 = scalar_lea.vmem [#allocation8], %s4435_s13 }
 0x1f0   : > { %v1172_v2 = vsel %vm1171_vm1, %v4512_v1, 0.0  ;;  %v3184_v9 = vld [vmem:[%s4487_s10] sm:$0xff]   ;;  %2884 = vmatprep.subr.bf16.mxu1 %v3766_v10  ;;  %2900 = vmatprep.subr.bf16.mxu0 %v3766_v10  ;;  %v3185_v11 = vld [vmem:[%s4477_s11 + $0x8] sm:$0xff]   ;;  %s4984_s12 = scalar_lea.vmem [#allocation10], %s4435_s13  ;;  %s4985_s26 = scalar_lea.vmem [#allocation13], %s4435_s13  ;;  %vm1463_vm3 = vcmask 31744  }
 0x1f1   : > { %1173 = vadd.xlane.f32.xlu0 %v1172_v2  ;;  %2885 = vmatpush3.bf16.msra.mxu1 %v3183_v8  ;;  %v3186_v12 = vld [vmem:[%s4487_s10 + $0x8] sm:$0xff]   ;;  %v2791_v17 = vld [vmem:[%s4983_s8] ss:$0 sm:$0xff]  ;;  %s4986_s3 = scalar_lea.vmem [#allocation11], %s4435_s13  ;;  %s3768_s20 = smov 112   ;;  %vm1540_vm4 = vcmask 64512  }
 0x1f2   : > { %2901 = vmatpush3.bf16.msra.mxu0 %v3184_v9  ;;  %2886 = vmatprep.subr.bf16.mxu1 %v3766_v10  ;;  %v2792_v19 = vld [vmem:[%s4984_s12] ss:$0 sm:$0xff]  ;;  %v3188_v24 = vld [vmem:[%s4482_s7 + $0x8] sm:$0xff]   ;;  %s3769_s23 = smov 120   ;;  %s3770_s14 = smov 4   ;;  %vm1776_vm5 = vcmask 1043456  }
 0x1f3   : > { %2902 = vmatprep.subr.bf16.mxu0 %v3766_v10  ;;  %2888 = vmatprep.mubr.msk.bf16.mxu1 %vm3767_vm2, %v3766_v10  ;;  %v3187_v22 = vld [vmem:[%s4482_s7] sm:$0xff]   ;;  %s3771_s15 = smov 104   ;;  %s3772_s10 = smov 124   ;;  %v1425_v55 = vld [vmem:[#allocation7] sm:$0xf]  ;;  %vm2303_vm7 = vcmask 523264  }
 0x1f4   : > { %2904 = vmatprep.mubr.msk.bf16.mxu0 %vm3767_vm2, %v3766_v10  ;;  %v2797_v33 = vld [vmem:[%s4985_s26] ss:$0 sm:$0xff]  ;;  %v1423_v57 = vld [vmem:[#allocation5] sm:$0xf]  ;;  %v4588_v60 = vunpack.c.l.bf16 %v1425_v55  ;;  %s4987_s30 = scalar_lea.vmem [#allocation14], %s4435_s13  ;;  %s4989_s25 = scalar_lea.vmem [#allocation17], %s4435_s13 }
 0x1f5   : > { %2887 = vmatpush3.bf16.msra.mxu1 %v3185_v11  ;;  %v2793_v37 = vld [vmem:[%s4986_s3] ss:$0 sm:$0xff]  ;;  %v4592_v62 = vunpack.c.l.bf16 %v1423_v57  ;;  %s4990_s4 = scalar_lea.vmem [#allocation19], %s4435_s13 }
 0x1f6   : > { %2903 = vmatpush3.bf16.msra.mxu0 %v3186_v12  ;;  %2892 = vmatprep.subr.bf16.mxu1 %v3766_v10 }
 0x1f7   : > { %2914 = vmatprep.subr.bf16.mxu0 %v3766_v10 }
 0x27e   : > { %v1174_v3 = vpop.xlane.xlu0 %1173 }
 0x27f   : > { %v1176_v4 = vmul.f32 0.03125, %v1174_v3 }
 0x281   : > { %v1177_v5 = vsub.f32 %v4512_v1, %v1176_v4 }
 0x283   : > { %v1178_v6 = vmul.f32 %v1177_v5, %v1177_v5 }
 0x285   : > { %v1179_v7 = vsel %vm1171_vm1, %v1178_v6, 0.0 }
 0x286   : > { %1180 = vadd.xlane.f32.xlu0 %v1179_v7 }
 0x313   : > { %v1181_v13 = vpop.xlane.xlu0 %1180 }
 0x314   : > { %v1182_v14 = vmul.f32 0.03125, %v1181_v13 }
 0x316   : > { %v1183_v15 = vadd.f32 1e-06, %v1182_v14 }
 0x318   : > { %3195 = vrsqrt.f32 %v1183_v15 }
 0x322   : > { %v3196_v16 = vpop.eup %3195 }
 0x323   : > { %v1185_v18 = vmul.f32 %v3196_v16, %v1177_v5 }
 0x325   : > { %v1192_v20 = vmul.f32 %v2791_v17, %v1185_v18 }
 0x327   : > { %v1199_v21 = vadd.f32 %v2792_v19, %v1192_v20 }
 0x329   : > { %v1200_v23 = vpack.c.bf16 %v1199_v21, %v1199_v21 }
 0x32b   : > { %2889 = vmatmul.mubr.msk.bf16.vlgmr.msra.gmra.mrb[0].mxu1 %vm1171_vm1, %v1200_v23  ;;  %2905 = vmatmul.mubr.msk.bf16.vlgmr.msra.gmra.mrb[0].mxu0 %vm1171_vm1, %v1200_v23 }
 0x32c   : > { %2893 = vmatpush3.bf16.msra.mxu1 %v3187_v22  ;;  %2896 = vmatprep.mubr.msk.bf16.mxu1 %vm3767_vm2, %v3766_v10 }
 0x32d   : > { %2894 = vmatprep.subr.bf16.mxu1 %v3766_v10  ;;  %2916 = vmatprep.mubr.msk.bf16.mxu0 %vm3767_vm2, %v3766_v10 }
 0x330   : > { %2895 = vmatpush3.bf16.msra.mxu1 %v3188_v24 }
 0x331   : > { %2908 = vmatprep.subr.bf16.mxu1 %v3766_v10 }
 0x333   : > { %2897 = vmatmul.mubr.msk.bf16.vlgmr.msra.gmra.mrb[4].mxu1 %vm1171_vm1, %v1200_v23 }
 0x334   : > { %2910 = vmatprep.mubr.msk.bf16.mxu1 %vm3767_vm2, %v3766_v10 }
 0x3fe   : > { %v1261_v25 = vpop.f32.mrb[0].mxu1  ;;  %v4549_v26 = vpop.f32.mrb[0].mxu0 }
 0x3ff   : > { %v2890_v27 = vpop.f32.mrb[1].mxu1  ;;  %v2906_v28 = vpop.f32.mrb[1].mxu0  ;;  %v1262_v40 = vadd.f32 %v2793_v37, %v1261_v25  ;;  %v2801_v37 = vld [vmem:[%s4987_s30] ss:$0 sm:$0xff] }
 0x400   : > { %v1264_v29 = vpop.f32.mrb[2].mxu1  ;;  %v1390_v30 = vpop.f32.mrb[2].mxu0 }
 0x401   : > { %v2891_v31 = vpop.f32.mrb[3].mxu1  ;;  %v2907_v32 = vpop.f32.mrb[3].mxu0  ;;  %v1431_v41 = vsub.f32 0.0, %v1262_v40  ;;  %v1427_v5 = vmul.f32 %v4592_v62, %v1262_v40 }
 0x406   : > { %v1324_v34 = vpop.f32.mrb[4].mxu1 }
 0x407   : > { %v1325_v35 = vadd.f32 %v2797_v33, %v1324_v34  ;;  %v2898_v36 = vpop.f32.mrb[5].mxu1 }
 0x408   : > { %v1327_v38 = vpop.f32.mrb[6].mxu1 }
 0x409   : > { %1407 = vrot.lane.b32.xlu0 %v1325_v35, %s3768_s20  ;;  %1404 = vrot.lane.b32.xlu1 %v1325_v35, %s3769_s23  ;;  %v2899_v39 = vpop.f32.mrb[7].mxu1  ;;  %v1484_v42 = vsub.f32 0.0, %v1325_v35  ;;  %v1480_v3 = vmul.f32 %v4592_v62, %v1325_v35 }
 0x40d   : > { %1451 = vrot.lane.b32.xlu0 %v1262_v40, %s3770_s14  ;;  %1394 = vrot.lane.b32.xlu1 %v1262_v40, %s3769_s23 }
 0x411   : > { %1410 = vrot.lane.b32.xlu1 %v1325_v35, %s3771_s15 }
 0x415   : > { %1397 = vrot.lane.b32.xlu1 %v1262_v40, %s3768_s20 }
 0x419   : > { %1400 = vrot.lane.b32.xlu1 %v1262_v40, %s3771_s15 }
 0x41d   : > { %1439 = vrot.lane.b32.xlu1 %v1431_v41, %s3772_s10 }
 0x421   : > { %1504 = vrot.lane.b32.xlu1 %v1325_v35, %s3770_s14 }
 0x425   : > { %1492 = vrot.lane.b32.xlu1 %v1484_v42, %s3772_s10 }
 0x47b   : > { %v1405_v43 = vpop.permute.xlu1 %1404  ;;  %v1408_v48 = vpop.permute.xlu0 %1407 }
 0x47c   : > { %v1485_v47 = vsub.f32 0.0, %v1405_v43  ;;  %v1486_v50 = vsub.f32 0.0, %v1408_v48  ;;  %v1481_v19 = vmul.f32 %v4592_v62, %v1405_v43  ;;  %v1482_v28 = vmul.f32 %v4592_v62, %v1408_v48 }
 0x47f   : > { %v1395_v44 = vpop.permute.xlu1 %1394  ;;  %v1452_v59 = vpop.permute.xlu0 %1451 }
 0x480   : > { %v1432_v45 = vsub.f32 0.0, %v1395_v44  ;;  %1453 = vrot.lane.b32.xlu0 %v1395_v44, %s3770_s14  ;;  %v1428_v23 = vmul.f32 %v4592_v62, %v1395_v44 }
 0x482   : > { %1441 = vrot.lane.b32.xlu1 %v1432_v45, %s3772_s10 }
 0x483   : > { %v4567_v46 = vpop.permute.xlu1 %1410 }
 0x484   : > { %1506 = vrot.lane.b32.xlu0 %v1405_v43, %s3770_s14  ;;  %v1487_v52 = vsub.f32 0.0, %v4567_v46  ;;  %v1483_v38 = vmul.f32 %v4592_v62, %v4567_v46 }
 0x486   : > { %1494 = vrot.lane.b32.xlu1 %v1485_v47, %s3772_s10  ;;  %v4623_v47 = vadd.f32 %v2801_v37, %v4549_v26 }
 0x487   : > { %v4571_v49 = vpop.permute.xlu1 %1397 }
 0x488   : > { %1508 = vrot.lane.b32.xlu0 %v1408_v48, %s3770_s14  ;;  %v1433_v54 = vsub.f32 0.0, %v4571_v49 }
 0x48a   : > { %1496 = vrot.lane.b32.xlu1 %v1486_v50, %s3772_s10 }
 0x48b   : > { %v4575_v51 = vpop.permute.xlu1 %1400 }
 0x48c   : > { %1510 = vrot.lane.b32.xlu0 %v4567_v46, %s3770_s14  ;;  %v1434_v58 = vsub.f32 0.0, %v4575_v51  ;;  %v1429_v46 = vmul.f32 %v4592_v62, %v4571_v49 }
 0x48e   : > { %1498 = vrot.lane.b32.xlu1 %v1487_v52, %s3772_s10 }
 0x48f   : > { %v1440_v53 = vpop.permute.xlu1 %1439 }
 0x490   : > { %1455 = vrot.lane.b32.xlu0 %v4571_v49, %s3770_s14  ;;  %v1464_v61 = vsel %vm1463_vm3, %v1440_v53, %v1452_v59  ;;  %v1430_v49 = vmul.f32 %v4592_v62, %v4575_v51 }
 0x491   : > { %v1468_v2 = vmul.f32 %v1464_v61, %v4588_v60  ;;  %v1536_v61 = vpack.c.bf16 %v4623_v47, %v4623_v47 }
 0x492   : > { %1443 = vrot.lane.b32.xlu1 %v1433_v54, %s3772_s10 }
 0x493   : > { %v1505_v56 = vpop.permute.xlu1 %1504  ;;  %v1472_v7 = vadd.f32 %v1468_v2, %v1427_v5  ;;  %v3773_v5 = vmov -1e+09  }
 0x494   : > { %1457 = vrot.lane.b32.xlu0 %v4575_v51, %s3770_s14 }
 0x495   : > { %v1476_v11 = vmul.f32 0.35355338, %v1472_v7 }
 0x496   : > { %1445 = vrot.lane.b32.xlu1 %v1434_v58, %s3772_s10 }
 0x497   : > { %v1493_v63 = vpop.permute.xlu1 %1492  ;;  %v1528_v12 = vpack.c.bf16 %v1476_v11, %v1476_v11 }
 0x498   : > { %v1516_v0 = vsel %vm1463_vm3, %v1493_v63, %v1505_v56 }
 0x499   : > { %v1520_v4 = vmul.f32 %v1516_v0, %v4588_v60 }
 0x49b   : > { %v1524_v6 = vadd.f32 %v1520_v4, %v1480_v3  ;;  %v1778_v3 = vsel %vm1776_vm5, %v1536_v61, 0 }
 0x49d   : > { %v1532_v8 = vpack.c.bf16 %v1524_v6, %v1524_v6 }
 0x49f   : > { %v1545_v9 = vsel %vm1540_vm4, %v1532_v8, 0 }
 0x4a0   : > { %2909 = vmatpush3.bf16.xpose.msra.mxu1 %v1545_v9 }
 0x4a1   : > { %2920 = vmatprep.subr.bf16.mxu1 %v3766_v10 }
 0x4a7   : > { %2911 = vmatmul.mubr.msk.bf16.vlgmr.msra.gmra.mrb[8].mxu1 %vm1540_vm4, %v1528_v12 }
 0x4a8   : > { %2922 = vmatprep.mubr.msk.bf16.mxu1 %vm3767_vm2, %v3766_v10 }
 0x4f2   : > { %v1454_v13 = vpop.permute.xlu0 %1453 }
 0x4f4   : > { %v1442_v14 = vpop.permute.xlu1 %1441 }
 0x4f5   : > { %v1465_v16 = vsel %vm1463_vm3, %v1442_v14, %v1454_v13 }
 0x4f6   : > { %v1507_v15 = vpop.permute.xlu0 %1506  ;;  %v1469_v20 = vmul.f32 %v1465_v16, %v4588_v60 }
 0x4f8   : > { %v1495_v17 = vpop.permute.xlu1 %1494  ;;  %v1473_v29 = vadd.f32 %v1469_v20, %v1428_v23 }
 0x4f9   : > { %v1517_v18 = vsel %vm1463_vm3, %v1495_v17, %v1507_v15 }
 0x4fa   : > { %v1521_v21 = vmul.f32 %v1517_v18, %v4588_v60  ;;  %v1509_v22 = vpop.permute.xlu0 %1508  ;;  %v1477_v39 = vmul.f32 0.35355338, %v1473_v29 }
 0x4fc   : > { %v1525_v24 = vadd.f32 %v1521_v21, %v1481_v19  ;;  %v1497_v25 = vpop.permute.xlu1 %1496  ;;  %v1529_v50 = vpack.c.bf16 %v1477_v39, %v1477_v39 }
 0x4fd   : > { %v1518_v27 = vsel %vm1463_vm3, %v1497_v25, %v1509_v22 }
 0x4fe   : > { %v1533_v30 = vpack.c.bf16 %v1525_v24, %v1525_v24  ;;  %v1522_v31 = vmul.f32 %v1518_v27, %v4588_v60  ;;  %v1511_v32 = vpop.permute.xlu0 %1510 }
 0x500   : > { %v1526_v33 = vadd.f32 %v1522_v31, %v1482_v28  ;;  %v1499_v34 = vpop.permute.xlu1 %1498  ;;  %v1591_v35 = vsel %vm1540_vm4, %v1533_v30, 0 }
 0x501   : > { %v1519_v36 = vsel %vm1463_vm3, %v1499_v34, %v1511_v32  ;;  %2915 = vmatpush3.bf16.xpose.msra.mxu0 %v1591_v35 }
 0x502   : > { %v1534_v40 = vpack.c.bf16 %v1526_v33, %v1526_v33  ;;  %v1523_v41 = vmul.f32 %v1519_v36, %v4588_v60  ;;  %v1456_v42 = vpop.permute.xlu0 %1455  ;;  %2926 = vmatprep.subr.bf16.mxu0 %v3766_v10 }
 0x504   : > { %v1527_v43 = vadd.f32 %v1523_v41, %v1483_v38  ;;  %v1444_v44 = vpop.permute.xlu1 %1443  ;;  %v1637_v45 = vsel %vm1540_vm4, %v1534_v40, 0 }
 0x505   : > { %v1466_v48 = vsel %vm1463_vm3, %v1444_v44, %v1456_v42  ;;  %2921 = vmatpush3.bf16.xpose.msra.mxu1 %v1637_v45 }
 0x506   : > { %v1535_v52 = vpack.c.bf16 %v1527_v43, %v1527_v43  ;;  %v1470_v53 = vmul.f32 %v1466_v48, %v4588_v60  ;;  %2932 = vmatprep.subr.bf16.mxu1 %v3766_v10  ;;  %v1458_v55 = vpop.permute.xlu0 %1457 }
 0x508   : > { %v1474_v54 = vadd.f32 %v1470_v53, %v1429_v46  ;;  %2917 = vmatmul.mubr.msk.bf16.vlgmr.msra.gmra.mrb[4].mxu0 %vm1540_vm4, %v1529_v50  ;;  %v1446_v56 = vpop.permute.xlu1 %1445  ;;  %v1683_v26 = vsel %vm1540_vm4, %v1535_v52, 0 }
 0x509   : > { %v1467_v57 = vsel %vm1463_vm3, %v1446_v56, %v1458_v55  ;;  %2927 = vmatpush3.bf16.xpose.msra.mxu0 %v1683_v26  ;;  %2928 = vmatprep.mubr.msk.bf16.mxu0 %vm3767_vm2, %v3766_v10 }
 0x50a   : > { %v1478_v58 = vmul.f32 0.35355338, %v1474_v54  ;;  %v1471_v59 = vmul.f32 %v1467_v57, %v4588_v60  ;;  %2938 = vmatprep.subr.bf16.mxu0 %v3766_v10  ;;  %v1163_v60 = vlaneseq }
 0x50c   : > { %v1530_v63 = vpack.c.bf16 %v1478_v58, %v1478_v58  ;;  %v1475_v0 = vadd.f32 %v1471_v59, %v1430_v49  ;;  %v1164_v62 = vshrl.u32 %v1163_v60, 7  ;;  %v1166_v4 = vand.u32 127, %v1163_v60 }
 0x50e   : > { %v1479_v2 = vmul.f32 0.35355338, %v1475_v0  ;;  %2923 = vmatmul.mubr.msk.bf16.vlgmr.msra.gmra.mrb[12].mxu1 %vm1540_vm4, %v1530_v63  ;;  %vm1167_vm6 = vcmp.ge.s32.totalorder %v1164_v62, %v1166_v4 }
 0x50f   : > { %2933 = vmatpush3.bf16.msra.mxu1 %v1778_v3  ;;  %2934 = vmatprep.mubr.msk.bf16.mxu1 %vm3767_vm2, %v3766_v10  ;;  %v1168_v6 = vsel %vm1167_vm6, 0.0, %v3773_v5  ;;  %v1962_v5 = vld [vmem:[%s4492_s28] sm:$0xf] }
 0x510   : > { %v1531_v51 = vpack.c.bf16 %v1479_v2, %v1479_v2  ;;  %2944 = vmatprep.subr.bf16.mxu1 %v3766_v10 }
 0x512   : > { %2929 = vmatmul.mubr.msk.bf16.vlgmr.msra.gmra.mrb[8].mxu0 %vm1540_vm4, %v1531_v51 }
 0x513   : > { %2940 = vmatprep.mubr.msk.bf16.mxu0 %vm3767_vm2, %v3766_v10 }
 0x57a   : > { %v1581_v7 = vpop.f32.mrb[8].mxu1 }
 0x57b   : > { %v1582_v8 = vadd.f32 %v1581_v7, %v1168_v6  ;;  %v2912_v9 = vpop.f32.mrb[9].mxu1 }
 0x57c   : > { %v1584_v11 = vpop.f32.mrb[10].mxu1 }
 0x57d   : > { %v2913_v12 = vpop.f32.mrb[11].mxu1  ;;  %v1725_v13 = vsel %vm1540_vm4, %v1582_v8, -inf }
 0x57e   : > { %1726 = vmax.xlane.f32.xlu1 %v1725_v13 }
 0x5db   : > { %v1627_v14 = vpop.f32.mrb[4].mxu0 }
 0x5dc   : > { %v1628_v15 = vadd.f32 %v1627_v14, %v1168_v6  ;;  %v2918_v16 = vpop.f32.mrb[5].mxu0 }
 0x5dd   : > { %v1630_v17 = vpop.f32.mrb[6].mxu0 }
 0x5de   : > { %v2919_v18 = vpop.f32.mrb[7].mxu0  ;;  %v1728_v19 = vsel %vm1540_vm4, %v1628_v15, -inf  ;;  %v1963_v17 = vld [vmem:[%s4492_s28 + $0x4] sm:$0xf] }
 0x5df   : > { %1729 = vmax.xlane.f32.xlu0 %v1728_v19  ;;  %v2016_v18 = vsel %vm1776_vm5, %v1963_v17, 0  ;;  %v1964_v19 = vld [vmem:[%s4492_s28 + $0x8] sm:$0xf] }
 0x5e1   : > { %v1673_v20 = vpop.f32.mrb[12].mxu1 }
 0x5e2   : > { %v1674_v21 = vadd.f32 %v1673_v20, %v1168_v6  ;;  %v2924_v22 = vpop.f32.mrb[13].mxu1 }
 0x5e3   : > { %v1676_v23 = vpop.f32.mrb[14].mxu1 }
 0x5e4   : > { %v2925_v24 = vpop.f32.mrb[15].mxu1  ;;  %v1731_v25 = vsel %vm1540_vm4, %v1674_v21, -inf  ;;  %v2062_v23 = vsel %vm1776_vm5, %v1964_v19, 0 }
 0x5e5   : > { %v1719_v27 = vpop.f32.mrb[8].mxu0  ;;  %1732 = vmax.xlane.f32.xlu0 %v1731_v25 }
 0x5e6   : > { %v1720_v28 = vadd.f32 %v1719_v27, %v1168_v6  ;;  %v2930_v29 = vpop.f32.mrb[9].mxu0  ;;  %v1965_v27 = vld [vmem:[%s4492_s28 + $0xc] sm:$0xf]  ;;  %s4988_s28 = scalar_lea.vmem [#allocation16], %s4435_s13  ;;  %s4992_s13 = sld [smem:[#allocation37_spill]] }
 0x5e7   : > { %v1722_v30 = vpop.f32.mrb[10].mxu0 }
 0x5e8   : > { %v2931_v31 = vpop.f32.mrb[11].mxu0  ;;  %v1734_v32 = vsel %vm1540_vm4, %v1720_v28, -inf }
 0x5e9   : > { %1735 = vmax.xlane.f32.xlu1 %v1734_v32  ;;  %v2108_v31 = vsel %vm1776_vm5, %v1965_v27, 0  ;;  %v3193_v27 = vld [vmem:[%s4497_s17 + $0x10] sm:$0xff]  }
 0x5ec   : > { %p2830_p13 = scmp.ne.s32.totalorder %s4992_s13, 1 }
 0x5ed   : > { %s4993_s1 = sld [smem:[#allocation67_spill]] (!%p2830_p13) }
 0x60b   : > { %v1727_v33 = vpop.xlane.xlu1 %1726 }
 0x60c   : > { %v1737_v34 = vsub.f32 %v1582_v8, %v1727_v33  ;;  %v1970_v8 = vsel %vm1776_vm5, %v1962_v5, 0 }
 0x60e   : > { %v1741_v35 = vmul.f32 1.442695, %v1737_v34 }
 0x610   : > { %3197 = vpow2.f32 %v1741_v35 }
 0x61a   : > { %v3198_v36 = vpop.eup %3197 }
 0x61b   : > { %v1749_v37 = vsel %vm1540_vm4, %v3198_v36, 0.0 }
 0x61c   : > { %1750 = vadd.xlane.f32.xlu0 %v1749_v37 }
 0x66c   : > { %v1730_v38 = vpop.xlane.xlu0 %1729 }
 0x66d   : > { %v1738_v39 = vsub.f32 %v1628_v15, %v1730_v38 }
 0x66f   : > { %v1743_v40 = vmul.f32 1.442695, %v1738_v39 }
 0x671   : > { %3199 = vpow2.f32 %v1743_v40 }
 0x672   : > { %v1733_v41 = vpop.xlane.xlu0 %1732 }
 0x673   : > { %v1739_v42 = vsub.f32 %v1674_v21, %v1733_v41 }
 0x675   : > { %v1745_v43 = vmul.f32 1.442695, %v1739_v42 }
 0x676   : > { %v1736_v50 = vpop.xlane.xlu1 %1735 }
 0x677   : > { %3201 = vpow2.f32 %v1745_v43  ;;  %v1740_v52 = vsub.f32 %v1720_v28, %v1736_v50 }
 0x679   : > { %v1747_v53 = vmul.f32 1.442695, %v1740_v52 }
 0x67b   : > { %v3200_v44 = vpop.eup %3199  ;;  %3203 = vpow2.f32 %v1747_v53 }
 0x67c   : > { %v1752_v45 = vsel %vm1540_vm4, %v3200_v44, 0.0 }
 0x67d   : > { %1753 = vadd.xlane.f32.xlu1 %v1752_v45 }
 0x681   : > { %v3202_v48 = vpop.eup %3201 }
 0x682   : > { %v1755_v46 = vsel %vm1540_vm4, %v3202_v48, 0.0 }
 0x683   : > { %1756 = vadd.xlane.f32.xlu0 %v1755_v46 }
 0x685   : > { %v3204_v55 = vpop.eup %3203 }
 0x686   : > { %v1758_v56 = vsel %vm1540_vm4, %v3204_v55, 0.0 }
 0x68e   : > { %1417 = vrot.lane.b32.xlu1 %v4623_v47, %s3768_s20 }
 0x699   : > { %1414 = vrot.lane.b32.xlu0 %v4623_v47, %s3769_s23 }
 0x6a9   : > { %v1751_v54 = vpop.xlane.xlu0 %1750 }
 0x6aa   : > { %3205 = vrcp.f32 %v1751_v54 }
 0x6b2   : > { %1759 = vadd.xlane.f32.xlu1 %v1758_v56 }
 0x6b4   : > { %v3206_v26 = vpop.eup %3205 }
 0x6b5   : > { %v1765_v57 = vmul.f32 %v3206_v26, %v3198_v36 }
 0x6b7   : > { %v1769_v49 = vpack.c.bf16 %v1765_v57, %v1765_v57 }
 0x6b9   : > { %2935 = vmatmul.mubr.msk.bf16.vlgmr.msra.gmra.mrb[16].mxu1 %vm1540_vm4, %v1769_v49 }
 0x6ba   : > { %2946 = vmatprep.mubr.msk.bf16.mxu1 %vm3767_vm2, %v3766_v10 }
 0x6c3   : > { %1420 = vrot.lane.b32.xlu1 %v4623_v47, %s3771_s15 }
 0x70a   : > { %v1754_v58 = vpop.xlane.xlu1 %1753 }
 0x70b   : > { %3207 = vrcp.f32 %v1754_v58 }
 0x70e   : > { %v1418_v59 = vpop.permute.xlu1 %1417 }
 0x70f   : > { %v1538_v61 = vpack.c.bf16 %v1418_v59, %v1418_v59 }
 0x710   : > { %v1757_v63 = vpop.xlane.xlu0 %1756 }
 0x711   : > { %v1870_v0 = vsel %vm1776_vm5, %v1538_v61, 0  ;;  %3209 = vrcp.f32 %v1757_v63 }
 0x712   : > { %2945 = vmatpush3.bf16.msra.mxu1 %v1870_v0 }
 0x713   : > { %2956 = vmatprep.subr.bf16.mxu1 %v3766_v10 }
 0x714   : > { %v1415_v2 = vpop.permute.xlu0 %1414 }
 0x715   : > { %v3208_v3 = vpop.eup %3207  ;;  %v1537_v51 = vpack.c.bf16 %v1415_v2, %v1415_v2 }
 0x716   : > { %v1766_v60 = vmul.f32 %v3208_v3, %v3200_v44  ;;  %v2817_v3 = vld [vmem:[%s4988_s28] ss:$0 sm:$0xff] }
 0x717   : > { %v1824_v62 = vsel %vm1776_vm5, %v1537_v51, 0 }
 0x718   : > { %2939 = vmatpush3.bf16.msra.mxu0 %v1824_v62  ;;  %v1770_v47 = vpack.c.bf16 %v1766_v60, %v1766_v60 }
 0x719   : > { %2950 = vmatprep.subr.bf16.mxu0 %v3766_v10 }
 0x71b   : > { %v3210_v4 = vpop.eup %3209  ;;  %2941 = vmatmul.mubr.msk.bf16.vlgmr.msra.gmra.mrb[12].mxu0 %vm1540_vm4, %v1770_v47 }
 0x71c   : > { %v1767_v6 = vmul.f32 %v3210_v4, %v3202_v48  ;;  %2952 = vmatprep.mubr.msk.bf16.mxu0 %vm3767_vm2, %v3766_v10 }
 0x71e   : > { %v1771_v7 = vpack.c.bf16 %v1767_v6, %v1767_v6 }
 0x720   : > { %2947 = vmatmul.mubr.msk.bf16.vlgmr.msra.gmra.mrb[20].mxu1 %vm1540_vm4, %v1771_v7 }
 0x721   : > { %2957 = vmatpush3.bf16.msra.mxu1 %v1970_v8  ;;  %2958 = vmatprep.mubr.msk.bf16.mxu1 %vm3767_vm2, %v3766_v10 }
 0x722   : > { %2968 = vmatprep.subr.bf16.mxu1 %v3766_v10 }
 0x73f   : > { %v1760_v9 = vpop.xlane.xlu1 %1759 }
 0x740   : > { %3211 = vrcp.f32 %v1760_v9 }
 0x743   : > { %v1421_v11 = vpop.permute.xlu1 %1420 }
 0x744   : > { %v1539_v12 = vpack.c.bf16 %v1421_v11, %v1421_v11 }
 0x746   : > { %v1916_v13 = vsel %vm1776_vm5, %v1539_v12, 0 }
 0x747   : > { %2951 = vmatpush3.bf16.msra.mxu0 %v1916_v13  ;;  %v3189_v13 = vld [vmem:[%s4462_s18] sm:$0xff]  }
 0x748   : > { %2962 = vmatprep.subr.bf16.mxu0 %v3766_v10 }
 0x74a   : > { %v3212_v14 = vpop.eup %3211 }
 0x74b   : > { %v1768_v15 = vmul.f32 %v3212_v14, %v3204_v55  ;;  %v3190_v14 = vld [vmem:[%s4462_s18 + $0x8] sm:$0xff]  }
 0x74d   : > { %v1772_v16 = vpack.c.bf16 %v1768_v15, %v1768_v15  ;;  %v3192_v15 = vld [vmem:[%s4497_s17 + $0x8] sm:$0xff]  }
 0x74f   : > { %2953 = vmatmul.mubr.msk.bf16.vlgmr.msra.gmra.mrb[16].mxu0 %vm1540_vm4, %v1772_v16 }
 0x750   : > { %2964 = vmatprep.mubr.msk.bf16.mxu0 %vm3767_vm2, %v3766_v10  ;;  %2963 = vmatpush3.bf16.msra.mxu0 %v2016_v18 }
 0x751   : > { %2974 = vmatprep.subr.bf16.mxu0 %v3766_v10 }
 0x78c   : > { %v1814_v20 = vpop.f32.mrb[16].mxu1 }
 0x78d   : > { %v1958_v21 = vpack.c.bf16 %v1814_v20, %v1814_v20  ;;  %v2936_v22 = vpop.f32.mrb[17].mxu1  ;;  %v2818_v20 = vld [vmem:[%s4989_s25] ss:$0 sm:$0xff] }
 0x78e   : > { %v1817_v24 = vpop.f32.mrb[18].mxu1  ;;  %v2819_v22 = vld [vmem:[%s4990_s4] ss:$0 sm:$0xff] }
 0x78f   : > { %v2937_v25 = vpop.f32.mrb[19].mxu1  ;;  %2959 = vmatmul.mubr.msk.bf16.vlgmr.msra.gmra.mrb[24].mxu1 %vm1540_vm4, %v1958_v21 }
 0x790   : > { %2969 = vmatpush3.bf16.msra.mxu1 %v2062_v23  ;;  %2970 = vmatprep.mubr.msk.bf16.mxu1 %vm3767_vm2, %v3766_v10 }
 0x791   : > { %2980 = vmatprep.subr.bf16.mxu1 %v3766_v10 }
 0x7ee   : > { %v1860_v28 = vpop.f32.mrb[12].mxu0 }
 0x7ef   : > { %v1959_v29 = vpack.c.bf16 %v1860_v28, %v1860_v28  ;;  %v2942_v30 = vpop.f32.mrb[13].mxu0  ;;  %v3194_v28 = vld [vmem:[%s4497_s17 + $0x18] sm:$0xff]  }
 0x7f0   : > { %v1863_v32 = vpop.f32.mrb[14].mxu0 }
 0x7f1   : > { %v2943_v33 = vpop.f32.mrb[15].mxu0  ;;  %2965 = vmatmul.mubr.msk.bf16.vlgmr.msra.gmra.mrb[20].mxu0 %vm1540_vm4, %v1959_v29  ;;  %v2820_v29 = vld [vmem:[%s998_s2] ss:$0 sm:$0xff] }
 0x7f2   : > { %2975 = vmatpush3.bf16.msra.mxu0 %v2108_v31  ;;  %2976 = vmatprep.mubr.msk.bf16.mxu0 %vm3767_vm2, %v3766_v10 }
 0x7f3   : > { %v1906_v34 = vpop.f32.mrb[20].mxu1  ;;  %2988 = vmatprep.subr.bf16.mxu0 %v3766_v10 }
 0x7f4   : > { %v1960_v35 = vpack.c.bf16 %v1906_v34, %v1906_v34  ;;  %v2948_v36 = vpop.f32.mrb[21].mxu1 }
 0x7f5   : > { %v1909_v37 = vpop.f32.mrb[22].mxu1 }
 0x7f6   : > { %v2949_v38 = vpop.f32.mrb[23].mxu1  ;;  %2971 = vmatmul.mubr.msk.bf16.vlgmr.msra.gmra.mrb[28].mxu1 %vm1540_vm4, %v1960_v35  ;;  %v2824_v37 = vld [vmem:[%s1153_s0] ss:$0 sm:$0xff] }
 0x7f7   : > { %2984 = vmatprep.mubr.msk.bf16.mxu1 %vm3767_vm2, %v3766_v10  ;;  %2981 = vmatpush3.bf16.msra.mxu1 %v3189_v13 }
 0x7f8   : > { %2982 = vmatprep.subr.bf16.mxu1 %v3766_v10 }
 0x7fb   : > { %2983 = vmatpush3.bf16.msra.mxu1 %v3190_v14 }
 0x822   : > { %v1952_v39 = vpop.f32.mrb[16].mxu0 }
 0x823   : > { %v1961_v40 = vpack.c.bf16 %v1952_v39, %v1952_v39  ;;  %v2954_v41 = vpop.f32.mrb[17].mxu0 }
 0x824   : > { %v1955_v42 = vpop.f32.mrb[18].mxu0 }
 0x825   : > { %v2955_v43 = vpop.f32.mrb[19].mxu0  ;;  %2977 = vmatmul.mubr.msk.bf16.vlgmr.msra.gmra.mrb[24].mxu0 %vm1540_vm4, %v1961_v40 }
 0x826   : > { %2996 = vmatprep.mubr.msk.bf16.mxu0 %vm3767_vm2, %v3766_v10 }
 0x862   : > { %v2006_v44 = vpop.f32.mrb[24].mxu1 }
 0x863   : > { %v2960_v45 = vpop.f32.mrb[25].mxu1  ;;  %v2150_v52 = vsel %vm1171_vm1, %v2006_v44, 0.0 }
 0x864   : > { %v2009_v48 = vpop.f32.mrb[26].mxu1 }
 0x865   : > { %v2961_v46 = vpop.f32.mrb[27].mxu1 }
 0x8c4   : > { %v2052_v50 = vpop.f32.mrb[20].mxu0 }
 0x8c5   : > { %v2151_v53 = vsel %vm1171_vm1, %v2052_v50, 0.0  ;;  %v2966_v54 = vpop.f32.mrb[21].mxu0 }
 0x8c6   : > { %v2152_v55 = vadd.f32 %v2151_v53, %v2150_v52  ;;  %v2055_v56 = vpop.f32.mrb[22].mxu0 }
 0x8c7   : > { %v2967_v26 = vpop.f32.mrb[23].mxu0  ;;  %v2831_v56 = vld [vmem:[%s4993_s1] ss:$0 sm:$0xff] (!%p2830_p13) }
 0x8c9   : > { %v2098_v57 = vpop.f32.mrb[28].mxu1 }
 0x8ca   : > { %v2153_v49 = vsel %vm1171_vm1, %v2098_v57, 0.0  ;;  %v2972_v58 = vpop.f32.mrb[29].mxu1 }
 0x8cb   : > { %v2154_v59 = vadd.f32 %v2153_v49, %v2152_v55  ;;  %v2101_v61 = vpop.f32.mrb[30].mxu1 }
 0x8cc   : > { %v2973_v63 = vpop.f32.mrb[31].mxu1 }
 0x8f8   : > { %v2144_v0 = vpop.f32.mrb[24].mxu0 }
 0x8f9   : > { %v2155_v2 = vsel %vm1171_vm1, %v2144_v0, 0.0  ;;  %v2978_v51 = vpop.f32.mrb[25].mxu0 }
 0x8fa   : > { %v2156_v60 = vadd.f32 %v2155_v2, %v2154_v59  ;;  %v2147_v62 = vpop.f32.mrb[26].mxu0 }
 0x8fb   : > { %v2979_v47 = vpop.f32.mrb[27].mxu0 }
 0x8fc   : > { %v2164_v4 = vadd.f32 %v2817_v3, %v2156_v60 }
 0x8fe   : > { %v2165_v5 = vadd.f32 %v2164_v4, %v4512_v1  ;;  %v3191_v1 = vld [vmem:[%s4497_s17] sm:$0xff]   ;;  %s4994_s17 = sld [smem:[#allocation68_spill]] (!%p2830_p13) }
 0x8ff   : > { %2989 = vmatpush3.bf16.msra.mxu0 %v3191_v1 }
 0x900   : > { %v2168_v6 = vsel %vm1171_vm1, %v2165_v5, 0.0  ;;  %2990 = vmatprep.subr.bf16.mxu0 %v3766_v10 }
 0x901   : > { %2169 = vadd.xlane.f32.xlu0 %v2168_v6 }
 0x903   : > { %2991 = vmatpush3.bf16.msra.mxu0 %v3192_v15 }
 0x904   : > { %2992 = vmatprep.subr.bf16.mxu0 %v3766_v10  ;;  %v2832_v57 = vld [vmem:[%s4994_s17] ss:$0 sm:$0xff] (!%p2830_p13) }
 0x907   : > { %2993 = vmatpush3.bf16.msra.mxu0 %v3193_v27 }
 0x908   : > { %2994 = vmatprep.subr.bf16.mxu0 %v3766_v10 }
 0x90b   : > { %2995 = vmatpush3.bf16.msra.mxu0 %v3194_v28 }
 0x98e   : > { %v2170_v7 = vpop.xlane.xlu0 %2169 }
 0x98f   : > { %v2171_v8 = vmul.f32 0.03125, %v2170_v7 }
 0x991   : > { %v2172_v9 = vsub.f32 %v2165_v5, %v2171_v8 }
 0x993   : > { %v2173_v11 = vmul.f32 %v2172_v9, %v2172_v9 }
 0x995   : > { %v2174_v12 = vsel %vm1171_vm1, %v2173_v11, 0.0 }
 0x996   : > { %2175 = vadd.xlane.f32.xlu1 %v2174_v12 }
 0xa23   : > { %v2176_v16 = vpop.xlane.xlu1 %2175 }
 0xa24   : > { %v2177_v17 = vmul.f32 0.03125, %v2176_v16 }
 0xa26   : > { %v2178_v18 = vadd.f32 1e-06, %v2177_v17 }
 0xa28   : > { %3213 = vrsqrt.f32 %v2178_v18 }
 0xa32   : > { %v3214_v19 = vpop.eup %3213 }
 0xa33   : > { %v2180_v21 = vmul.f32 %v3214_v19, %v2172_v9 }
 0xa35   : > { %v2187_v23 = vmul.f32 %v2818_v20, %v2180_v21 }
 0xa37   : > { %v2194_v24 = vadd.f32 %v2819_v22, %v2187_v23 }
 0xa39   : > { %v2195_v25 = vpack.c.bf16 %v2194_v24, %v2194_v24 }
 0xa3b   : > { %2985 = vmatmul.mubr.msk.bf16.vlgmr.msra.gmra.mrb[32].mxu1 %vm1171_vm1, %v2195_v25 }
 0xb0e   : > { %v2256_v30 = vpop.f32.mrb[32].mxu1 }
 0xb0f   : > { %v2257_v31 = vadd.f32 %v2820_v29, %v2256_v30  ;;  %v2986_v32 = vpop.f32.mrb[33].mxu1 }
 0xb10   : > { %v2259_v33 = vpop.f32.mrb[34].mxu1 }
 0xb11   : > { %v2262_v34 = vmax.f32 %v2257_v31, 0.0  ;;  %v2987_v35 = vpop.f32.mrb[35].mxu1 }
 0xb13   : > { %v2263_v36 = vpack.c.bf16 %v2262_v34, %v2262_v34 }
 0xb15   : > { %2997 = vmatmul.mubr.msk.bf16.vlgmr.msra.gmra.mrb[28].mxu0 %vm2303_vm7, %v2263_v36 }
 0xbe7   : > { %2352 = sbr.rel (%p2830_p13) target bundleno = 3367 (0xd27), region = 164 }
 0xbe8   : > { %v2341_v10 = vpop.f32.mrb[28].mxu0 }
 0xbe9   : > { %v2342_v38 = vadd.f32 %v2824_v37, %v2341_v10  ;;  %v2998_v39 = vpop.f32.mrb[29].mxu0 }
 0xbea   : > { %v2344_v40 = vpop.f32.mrb[30].mxu0 }
 0xbeb   : > { %v2347_v41 = vadd.f32 %v2342_v38, %v2165_v5  ;;  %v2999_v42 = vpop.f32.mrb[31].mxu0 }
 0xbed   : > { %2348 = vst.msk [vmem:[%s4506_s27] sm:$0xff] %vm1171_vm1, %v2347_v41  ;;  %v2355_v43 = vsel (!%p2830_p13), %vm1171_vm1, %v2347_v41, 0.0 }
 0xbee   : > { %2356 = vadd.xlane.f32.xlu0 %v2355_v43 }
 0xc7b   : > { %v2357_v44 = vpop.xlane.xlu0 %2356 }
 0xc7c   : > { %v2358_v45 = vmul.f32 0.03125, %v2357_v44 }
 0xc7e   : > { %v2359_v48 = vsub.f32 %v2347_v41, %v2358_v45 }
 0xc80   : > { %v2360_v46 = vmul.f32 %v2359_v48, %v2359_v48 }
 0xc82   : > { %v2361_v50 = vsel %vm1171_vm1, %v2360_v46, 0.0 }
 0xc83   : > { %2362 = vadd.xlane.f32.xlu0 %v2361_v50 }
 0xd10   : > { %v2363_v52 = vpop.xlane.xlu0 %2362 }
 0xd11   : > { %v2364_v53 = vmul.f32 0.03125, %v2363_v52 }
 0xd13   : > { %v2365_v54 = vadd.f32 1e-06, %v2364_v53 }
 0xd15   : > { %3215 = vrsqrt.f32 %v2365_v54 }
 0xd1f   : > { %v3216_v55 = vpop.eup %3215 }
 0xd20   : > { %v2367_v26 = vmul.f32 %v3216_v55, %v2359_v48 }
 0xd22   : > { %v2374_v49 = vmul.f32 %v2831_v56, %v2367_v26 }
 0xd24   : > { %v2381_v58 = vadd.f32 %v2832_v57, %v2374_v49 }
 0xd26   : > { %2382 = vst.msk [vmem:[%s4506_s27] sm:$0xff] %vm1171_vm1, %v2381_v58 }
 0xd27 PF: > { %s4995_s19 = sld [smem:[#allocation38_spill]]  ;;  %s4996_s8 = sld [smem:[#allocation69_spill]] }
 0xd28   : > { %s2397_s26 = sshll.u32 %s4506_s27, 4  ;;  %s2384_s3 = scalar_lea.sflag [#allocation4], %s4417_s21  ;;  %s2398_s26 = int_to_ptr.vmem [resolvable:$true] %s2397_s26 }
 0xd29   : > { %s3603_s20 = scalar_lea.vmem %s2398_s26, 128  ;;  %p4997_p8 = scmp.ne.s32.totalorder %s4943_s24, 0 }
 0xd2a   : > { %p3604_p5 = scmp.ne.s32.totalorder %s2398_s26, %s3603_s20  ;;  %s3774_s23 = smov [#allocation23]  }
 0xd2b   : > { %s3607_s14 = sshll.u32 %s3774_s23, 4  ;;  %s3608_s14 = int_to_ptr.vmem [resolvable:$false] %s3607_s14 }
 0xd2c   : > { %p3605_p10 = pnand %p3604_p5, %p4997_p8  ;;  %s3609_s15 = scalar_lea.vmem %s3608_s14, 256 }
 0xd2d   : > { %s2834_s22 = sshll.u32 %s4995_s19, 7  ;;  %p3610_p6 = scmp.lt.s32.totalorder %s2398_s26, %s3608_s14 }
 0xd2e   : > { %s4753_s12 = scalar_lea.hbm %s4996_s8, %s2834_s22  ;;  %p3606_p0 = pneg %p3605_p10 }
 0xd2f   : > { %p3611_p7 = scmp.lt.s32.totalorder %s3609_s15, %s3603_s20 }
 0xd31   : > { %p3612_p3 = por %p3611_p7, %p3610_p6 }
 0xd33   : > { %p3613_p9 = pnand %p3612_p3, %p3606_p0 }
 0xd35   : > { %3616 = shalt.err (!%p3613_p9)
}
 0xd36   : > { %s3617_s27 = scalar_lea.hbm %s4753_s12, 128  ;;  %s3621_s30 = scalar_lea.hbm %s4996_s8, 256 }
 0xd37   : > { %p3618_p12 = scmp.ne.s32.totalorder %s4753_s12, %s3617_s27  ;;  %p3622_p2 = scmp.lt.u32.totalorder %s4753_s12, %s4996_s8 }
 0xd38   : > { %p3623_p1 = scmp.lt.u32.totalorder %s3621_s30, %s3617_s27  ;;  %p3625_p5 = scmp.lt.u32.totalorder %s3617_s27, %s4753_s12 }
 0xd39   : > { %p3619_p4 = pnand %p3618_p12, %p4997_p8 }
 0xd3a   : > { %p3624_p13 = por %p3623_p1, %p3622_p2 }
 0xd3b   : > { %p3620_p11 = pneg %p3619_p4 }
 0xd3c   : > { %p3626_p10 = por %p3625_p5, %p3624_p13 }
 0xd3e   : > { %p3627_p0 = pnand %p3626_p10, %p3620_p11 }
 0xd40   : > { %3630 = shalt.err (!%p3627_p0)
}
 0xd41   : > { %3030 = dma.vmem_to_hbm [thread:$0]  (%p4997_p8), %s2398_s26, 128, %s4753_s12, %s2384_s3  }
 0xd42 PF: > { %s4998_s4 = sld [smem:[#allocation34_spill]]  ;;  %s4999_s7 = sld [smem:[#allocation47_spill]] }
 0xd43   : > { %p3082_p6 = scmp.ge.s32.totalorder %s3749_s5, 2 }
 0xd48   : > { %s2409_s11 = sand.u32 1, %s4998_s4   ;;  %p5000_p7 = scmp.ne.s32.totalorder %s4999_s7, 0 }
 0xd49   : > { %s2410_s18 = scalar_lea.sflag [#allocation4], %s2409_s11 }
 0xd4a   : > { %p3074_p3 = pnand %p3082_p6, %p5000_p7 }
 0xd4c   : > { %3704 = dma.done.wait (!%p3074_p3), %s2410_s18, 128  }
 0xd4d   : > { %3706 = vsyncadd (!%p3074_p3), %s2410_s18, 4294967168  ;;  %s53_s5 = sadd.s32 1, %s3749_s5   ;;  %s5001_s2 = sld [smem:[#allocation32_spill]] }
 0xd4e   : > { %p50_p9 = scmp.ge.s32.totalorder %s53_s5, 6   ;;  %s5002_s25 = sld [smem:[#allocation33_spill]] }
 0xd4f   : > { %s5003_s26 = sld [smem:[#allocation45_spill]]  ;;  %s5004_s27 = sld [smem:[#allocation35_spill]] }
 0xd50   : > { %s5005_s3 = sld [smem:[#allocation36_spill]]  ;;  %s5006_s28 = sld [smem:[#allocation46_spill]] }
 0xd51   : > { %s5007_s29 = sld [smem:[#allocation39_spill]]  ;;  %s5008_s0 = sld [smem:[#allocation40_spill]] }
 0xd52   : > { %s5009_s4 = sld [smem:[#allocation43_spill]]  ;;  %s5010_s30 = sld [smem:[#allocation44_spill]] }
 0xd53   :  { %52 = sbr.rel (!%p50_p9) target bundleno = 43 (0x2b), region = 303 }
 0xd5a   :  { %2415 = vsyncpa [#allocation3], 1 }
 0xd5b   :  { %2417 = vsyncpa [#allocation3 + $0x1], 1 }
 0xd5c   :  { %2418 = vsyncpa [#allocation6], 1 }
 0xd5d   :  { %2419 = vsyncpa [#allocation9], 1 }
 0xd5e   :  { %2421 = vsyncpa [#allocation9 + $0x1], 1 }
 0xd5f   :  { %2422 = vsyncpa [#allocation12], 1 }
 0xd60   :  { %2424 = vsyncpa [#allocation12 + $0x1], 1 }
 0xd61   :  { %2425 = vsyncpa [#allocation15], 1 }
 0xd62   :  { %2427 = vsyncpa [#allocation15 + $0x1], 1 }
 0xd63   :  { %2428 = vsyncpa [#allocation18], 1 }
 0xd64   :  { %2430 = vsyncpa [#allocation18 + $0x1], 1 }
 0xd65   :  { %2431 = vsyncpa [#allocation21], 1 }
 0xd66   :  { %2433 = vsyncpa [#allocation21 + $0x1], 1 }
 0xd67   :  { %2434 = vsyncpa [#allocation4], 1 }
 0xd68   :  { %2436 = vsyncpa [#allocation4 + $0x1], 1 }

</bundles_post_ra>
